<compile_context>
chip_gen: v7x
topology: tpu7x:2x2x1
jax: 0.10.0
libtpu: 0.0.40
codegen_flags: <defaults>
</compile_context>

<pallas_src>
import jax
import jax.numpy as jnp
from jax.experimental import pallas as pl
from jax.experimental.pallas import tpu as pltpu


# ----------------------------- kernel bodies ------------------------------ #

def _bmm_kernel_simple(a_ref, b_ref, o_ref):
    # a_ref: (G, sm, S) ; b_ref: (G, S, D) ; o_ref: (G, sm, D).  Single K step.
    o_ref[...] = jnp.einsum(
        "gsk,gkd->gsd", a_ref[...], b_ref[...],
        preferred_element_type=jnp.float32,
    ).astype(o_ref.dtype)


def _bmm_kernel_ktiled_f32out(a_ref, b_ref, o_ref):
    # f32 output: accumulate directly into the resident output block.
    k = pl.program_id(2)

    @pl.when(k == 0)
    def _():
        o_ref[...] = jnp.zeros_like(o_ref)

    o_ref[...] += jnp.einsum(
        "gsk,gkd->gsd", a_ref[...], b_ref[...],
        preferred_element_type=jnp.float32,
    )


def _bmm_kernel_ktiled_acc(a_ref, b_ref, o_ref, acc_ref):
    # Non-f32 output: accumulate in an f32 scratch, cast on the last K step.
    k = pl.program_id(2)

    @pl.when(k == 0)
    def _():
        acc_ref[...] = jnp.zeros_like(acc_ref)

    acc_ref[...] += jnp.einsum(
        "gsk,gkd->gsd", a_ref[...], b_ref[...],
        preferred_element_type=jnp.float32,
    )

    @pl.when(k == pl.num_programs(2) - 1)
    def _():
        o_ref[...] = acc_ref[...].astype(o_ref.dtype)


# ----------------------------- tiling helpers ------------------------------ #

def _vmem_capacity_bytes():
    """Per-generation VMEM capacity; conservative 64 MiB (v7x) if unknown."""
    try:
        info = pltpu.get_tpu_info()
        cap = int(getattr(info, "vmem_capacity_bytes", 0))
        if cap > 0:
            return cap
    except Exception:
        pass
    return 64 << 20


def _choose_tiles(S, D, itemsize, budget_bytes):
    """Pick (sm, tk) tiles of the S (rows) and K (contraction) axes so that a
    single-head double-buffered block fits the VMEM budget."""

    def blk_bytes(sm, tk):
        return 2 * (sm * tk + tk * D + sm * D) * itemsize

    if blk_bytes(S, S) <= budget_bytes:
        return S, S

    # Tile K first (output block stays resident across k).  tk is the lane
    # (last) dim of the A block -> must be a multiple of 128 when < S.
    for tk in (1024, 768, 512, 384, 256, 128):
        if S % tk == 0 and blk_bytes(S, tk) <= budget_bytes:
            return S, tk

    # Tile rows (sm) as well.  sm is a sublane dim -> multiple of 8 when < S.
    for sm in (1024, 512, 256, 128, 64, 8):
        if S % sm != 0:
            continue
        for tk in (1024, 768, 512, 384, 256, 128):
            if S % tk == 0 and blk_bytes(sm, tk) <= budget_bytes:
                return sm, tk

    # TODO(synk): shapes with S not divisible by 128 and too large for VMEM
    # would need padding; fall back to full S and the raised vmem limit.
    return S, S


def _pick_num_groups(BH, sm, tk, D, itemsize, budget_bytes):
    """Heads packed per grid step.  Target ~1 MB of A-block per step (keeps
    the DMA pipeline busy and gives >= 4-8 grid steps on the spec shape) while
    staying inside the double-buffered VMEM budget."""
    target_lo = 1 << 20  # ~1 MB A-block per step
    best = 1
    for G in sorted(g for g in range(1, BH + 1) if BH % g == 0):
        blk = 2 * G * (sm * tk + tk * D + sm * D) * itemsize
        if blk > budget_bytes:
            break
        best = G
        if G * sm * tk * itemsize >= target_lo:
            break

    # Keep >= 2 steps on the parallel head-group axis when possible so v7x
    # megacore can shard head groups across its two TensorCores.
    if BH > 1 and BH // best == 1:
        for G in sorted((g for g in range(1, BH) if BH % g == 0), reverse=True):
            if BH // G >= 2:
                best = G
                break

    return BH // best


# --------------------------------- wrapper --------------------------------- #

def batched_matmul(x350, x343):
    """x350: [B, H, S, S], x343: [B, H, S, D] -> [B, H, S, D]."""
    B, H, S, S2 = x350.shape
    Bv, Hv, Sv, D = x343.shape
    assert (B, H, S) == (Bv, Hv, Sv) and S2 == Sv, "shape mismatch"

    BH = B * H
    a = x350.reshape(BH, S, S)
    b = x343.reshape(BH, S, D)
    out_dtype = x350.dtype
    itemsize = jnp.dtype(x350.dtype).itemsize

    vmem_cap = _vmem_capacity_bytes()
    budget = max(vmem_cap // 4, 8 << 20)

    sm, tk = _choose_tiles(S, D, itemsize, budget)
    num_m = S // sm
    num_k = S // tk

    num_groups = _pick_num_groups(BH, sm, tk, D, itemsize, budget)
    G = BH // num_groups

    # Kernel / scratch selection.
    scratch_shapes = []
    if num_k == 1:
        kernel = _bmm_kernel_simple
    elif jnp.dtype(out_dtype) == jnp.float32:
        kernel = _bmm_kernel_ktiled_f32out
    else:
        kernel = _bmm_kernel_ktiled_acc
        scratch_shapes = [pltpu.VMEM((G, sm, D), jnp.float32)]

    vmem_need = 2 * G * (sm * tk + tk * D + sm * D) * itemsize
    if scratch_shapes:
        vmem_need += G * sm * D * 4
    vmem_limit = int(
        min(max(vmem_need * 5 // 4 + (1 << 20), 32 << 20), vmem_cap - (8 << 20))
    )

    cost = pl.CostEstimate(
        flops=2 * BH * S * S * D,
        transcendentals=0,
        bytes_accessed=itemsize * (BH * S * S + 2 * BH * S * D),
    )

    out = pl.pallas_call(
        kernel,
        out_shape=jax.ShapeDtypeStruct((BH, S, D), out_dtype),
        grid_spec=pltpu.PrefetchScalarGridSpec(
            num_scalar_prefetch=0,
            grid=(num_groups, num_m, num_k),
            in_specs=[
                pl.BlockSpec((G, sm, tk), lambda g, m, k: (g, m, k)),
                pl.BlockSpec((G, tk, D), lambda g, m, k: (g, k, 0)),
            ],
            out_specs=pl.BlockSpec((G, sm, D), lambda g, m, k: (g, m, 0)),
            scratch_shapes=scratch_shapes,
        ),
        compiler_params=pltpu.CompilerParams(
            dimension_semantics=("parallel", "parallel", "arbitrary"),
            vmem_limit_bytes=vmem_limit,
        ),
        cost_estimate=cost,
    )(a, b)

    return out.reshape(B, H, S, D)


if __name__ == "__main__":
    # Shapes from the PyTorch module: [1, 12, 384, 384] @ [1, 12, 384, 64].
    B, H, S, D = 1, 12, 384, 64
    key = jax.random.PRNGKey(0)
    k1, k2, k3, k4 = jax.random.split(key, 4)
    x350 = jax.random.normal(k1, (B, H, S, S), dtype=jnp.float32)
    x343 = jax.random.normal(k2, (B, H, S, D), dtype=jnp.float32)

    out = batched_matmul(x350, x343)
    jax.block_until_ready(out)
    ref = jnp.einsum("bhsk,bhkd->bhsd", x350, x343)
    assert out.shape == (B, H, S, D)
    assert jnp.allclose(out, ref, atol=1e-3, rtol=1e-3), "mismatch (main shape)"

    # Small odd-head shape exercises the grouping / megacore fallback path.
    B2, H2, S2, D2 = 1, 3, 128, 64
    y350 = jax.random.normal(k3, (B2, H2, S2, S2), dtype=jnp.float32)
    y343 = jax.random.normal(k4, (B2, H2, S2, D2), dtype=jnp.float32)
    out2 = batched_matmul(y350, y343)
    jax.block_until_ready(out2)
    ref2 = jnp.einsum("bhsk,bhkd->bhsd", y350, y343)
    assert jnp.allclose(out2, ref2, atol=1e-3, rtol=1e-3), "mismatch (odd heads)"

    print("KERNEL_OK")
</pallas_src>

<mosaic_0001>
module attributes {stable_mosaic.version = 11 : i64} {
  func.func @_bmm_kernel_simple(%arg0: i32, %arg1: i32, %arg2: i32, %arg3: memref<2x384x384xf32, #tpu.memory_space<vmem>>, %arg4: memref<2x384x64xf32, #tpu.memory_space<vmem>>, %arg5: memref<2x384x64xf32, #tpu.memory_space<vmem>>) attributes {dimension_semantics = [#tpu.dimension_semantics<parallel>, #tpu.dimension_semantics<parallel>, #tpu.dimension_semantics<arbitrary>], iteration_bounds = array<i64: 6, 1, 1>, scalar_prefetch = 0 : i64, scratch_operands = 0 : i64, tpu.core_type = #tpu.core_type<tc>, window_params = [{transform_indices = @transform_0, window_bounds = array<i64: 2, 384, 384>}, {transform_indices = @transform_1, window_bounds = array<i64: 2, 384, 64>}, {transform_indices = @transform_2, window_bounds = array<i64: 2, 384, 64>}]} {
    %c0 = arith.constant 0 : index
    %c0_0 = arith.constant 0 : index
    %c0_1 = arith.constant 0 : index
    %0 = vector.load %arg3[%c0, %c0_0, %c0_1] : memref<2x384x384xf32, #tpu.memory_space<vmem>>, vector<2x384x384xf32>
    %c0_2 = arith.constant 0 : index
    %c0_3 = arith.constant 0 : index
    %c0_4 = arith.constant 0 : index
    %1 = vector.load %arg4[%c0_2, %c0_3, %c0_4] : memref<2x384x64xf32, #tpu.memory_space<vmem>>, vector<2x384x64xf32>
    "tpu.trace_start"() <{level = 10 : i32, message = "gsk,gkd->gsd"}> : () -> ()
    %cst = arith.constant dense<0.000000e+00> : vector<2x384x64xf32>
    %2 = tpu.matmul %0, %1, %cst {dimension_numbers = #tpu.dot_dimension_numbers<[2], [1], [1], [2], [0, 0, 0, 1, 1, 2], [0], [0]>} : vector<2x384x384xf32>, vector<2x384x64xf32>, vector<2x384x64xf32> -> vector<2x384x64xf32>
    "tpu.trace_stop"() : () -> ()
    %c0_5 = arith.constant 0 : index
    %c0_6 = arith.constant 0 : index
    %c0_7 = arith.constant 0 : index
    %3 = vector.load %arg5[%c0_5, %c0_6, %c0_7] : memref<2x384x64xf32, #tpu.memory_space<vmem>>, vector<2x384x64xf32>
    tpu.vector_store %arg5[%c0_5, %c0_6, %c0_7], %2 {strides = array<i32>} : memref<2x384x64xf32, #tpu.memory_space<vmem>>, vector<2x384x64xf32>,
    return
  }
  func.func @transform_0(%arg0: i32, %arg1: i32, %arg2: i32) -> (i32, i32, i32) {
    %c0_i32 = arith.constant 0 : i32
    return %arg0, %arg1, %arg2 : i32, i32, i32
  }
  func.func @transform_1(%arg0: i32, %arg1: i32, %arg2: i32) -> (i32, i32, i32) {
    %c0_i32 = arith.constant 0 : i32
    %c0_i32_0 = arith.constant 0 : i32
    return %arg0, %arg2, %c0_i32 : i32, i32, i32
  }
  func.func @transform_2(%arg0: i32, %arg1: i32, %arg2: i32) -> (i32, i32, i32) {
    %c0_i32 = arith.constant 0 : i32
    %c0_i32_0 = arith.constant 0 : i32
    return %arg0, %arg1, %c0_i32 : i32, i32, i32
  }
}

</mosaic_0001>

<bundles_post_ra>
// kernel: tpu_custom_call.1
= control target key start
LH: loop header
LB: loop body
LE: loop exit
PB: predicated region body
PF: predicated region fallthrough
CT: control target
= control target key end

     0   :  { %7 = vsyncpa [#allocation3], 0  ;;  %s3821_s0 = inlined_call_operand.hbm [shape: f32[12,384,384], index: 0, kind: input, shape index: {}]   ;;  %s3822_s1 = inlined_call_operand.vmem [shape: f32[12,384,64], index: 1, kind: input, shape index: {}]   ;;  %s3823_s2 = inlined_call_operand.vmem [shape: f32[12,384,64], index: 2, kind: output, shape index: {}]  }
   0x1   :  { %9 = vsyncpa [#allocation3 + $0x1], 0  ;;  %s2762_s9 = smov 0   ;;  %s2764_s10 = smov 0  }
   0x2   :  { %s2766_s11 = smov 0   ;;  %s2768_s12 = smov 0  }
   0x3   :  { %s2770_s13 = smov 0   ;;  %s2772_s14 = smov 0  }
   0x4 LB: > { %s2073_s15 = sadd.s32 4294967295, %s2741_s14   ;;  %s34_s16 = sadd.s32 1, %s2737_s13  ;;  %s2741_s14 = sphi %s2772_s14, %s15_s14   ;;  %s2737_s13 = sphi %s2770_s13, %s3830_s13   ;;  %s2733_s12 = sphi %s2768_s12, %s3829_s12   ;;  %s2729_s11 = sphi %s2766_s11, %s3828_s11   ;;  %s2725_s10 = sphi %s2764_s10, %s3827_s10   ;;  %s2721_s9 = sphi %s2762_s9, %s3826_s9  }
   0x5   : > { %p36_p0 = scmp.ge.s32.totalorder %s34_s16, 6  ;;  %s45_s17 = sadd.s32 1, %s2729_s11 }
   0x6   : > { %p52_p1 = scmp.ne.s32.totalorder %s2729_s11, %s2725_s10  ;;  %p53_p2 = scmp.eq.s32.totalorder %s2741_s14, 0 }
   0x7   : > { %s3832_s16 = smov (%p36_p0, %s34_s16), 0  ;;  %p58_p4 = scmp.ne.s32.totalorder %s2725_s10, %s2721_s9 }
   0x8   : > { %p54_p3 = por %p53_p2, %p52_p1  ;;  %s38_s18 = ssub.s32 %s2737_s13, %s3832_s16 }
   0x9   : > { %p59_p5 = scmp.eq.s32.totalorder %s2073_s15, 0  ;;  %p43_p6 = scmp.eq.s32.totalorder %s38_s18, 0 }
   0xa   : > { %p2609_p8 = scmp.lt.s32.totalorder %s2741_s14, 6  ;;  %s138_s21 = sand.u32 1, %s2729_s11  }
   0xb   : > { %p2801_p7 = por %p59_p5, %p58_p4  ;;  %s2600_s22 = smul.u32 36864, %s2737_s13 }
   0xc   : > { %s2807_s20 = scalar_select %p43_p6, %s2729_s11, %s45_s17  }
   0xd   : > { %s2599_s23 = smul.u32 2304, %s138_s21  ;;  %s2814_s26 = scalar_lea.hbm %s3821_s0, %s2600_s22 }
   0xe   : > { %p2816_p9 = pnand %p2609_p8, %p54_p3  ;;  %s2822_s30 = scalar_lea.sflag [#allocation3], %s138_s21 }
   0xf   : > { %s142_s28 = scalar_lea.vmem [#allocation2], %s2599_s23  ;;  %s2661_s3 = scalar_lea.hbm %s2814_s26, 36864 }
  0x10   : > { %s155_s29 = sshll.u32 %s142_s28, 4  ;;  %p2662_p10 = scmp.ne.s32.totalorder %s2814_s26, %s2661_s3  ;;  %s2820_s29 = int_to_ptr.vmem [resolvable:$true] %s155_s29 }
  0x11   : > { %p2663_p11 = pneg %p2816_p9  ;;  %s2666_s6 = scalar_lea.hbm %s3821_s0, 221184 }
  0x12   : > { %p2667_p0 = scmp.lt.u32.totalorder %s2814_s26, %s3821_s0  ;;  %p2668_p1 = scmp.lt.u32.totalorder %s2666_s6, %s2661_s3 }
  0x13   : > { %p2664_p12 = pnand %p2663_p11, %p2662_p10  ;;  %p2670_p3 = scmp.lt.u32.totalorder %s2661_s3, %s2814_s26 }
  0x14   : > { %p2669_p2 = por %p2668_p1, %p2667_p0 }
  0x15   : > { %p2665_p13 = pneg %p2664_p12 }
  0x16   : > { %p2671_p4 = por %p2670_p3, %p2669_p2 }
  0x18   : > { %p2672_p5 = pnand %p2671_p4, %p2665_p13 }
  0x1a   : > { %2675 = shalt.err (!%p2672_p5)
}
  0x1b   : > { %s2676_s9 = scalar_lea.vmem %s2820_s29, 36864  ;;  %s2743_s15 = smov [#allocation2]  }
  0x1c   : > { %p2677_p6 = scmp.ne.s32.totalorder %s2820_s29, %s2676_s9  ;;  %s2681_s17 = sshll.u32 %s2743_s15, 4  ;;  %s2682_s17 = int_to_ptr.vmem [resolvable:$false] %s2681_s17 }
  0x1d   : > { %s2683_s18 = scalar_lea.vmem %s2682_s17, 73728  ;;  %p2684_p12 = scmp.lt.s32.totalorder %s2820_s29, %s2682_s17 }
  0x1e   : > { %p2679_p8 = pnand %p2677_p6, %p2663_p11  ;;  %p2685_p0 = scmp.lt.s32.totalorder %s2683_s18, %s2676_s9 }
  0x20   : > { %p2680_p10 = pneg %p2679_p8  ;;  %p2686_p1 = por %p2685_p0, %p2684_p12 }
  0x22   : > { %p2687_p2 = pnand %p2686_p1, %p2680_p10 }
  0x24   : > { %2690 = shalt.err (!%p2687_p2)
}
  0x25   : > { %s2744_s21 = smov 384   ;;  %s2745_s22 = smov 24  }
  0x26   : > { %2608 = dma.hbm_to_vmem [thread:$0]  (!%p2816_p9), %s2814_s26, 36864, %s2820_s29, %s2822_s30, %s2744_s21, %s2744_s21, %s2745_s22  }
  0x27   : > { %p2080_p11 = scmp.ge.s32.totalorder %s2741_s14, 1  ;;  %p178_p13 = scmp.lt.s32.totalorder %s2741_s14, 7 }
  0x29   : > { %p179_p3 = pnand %p2080_p11, %p178_p13 }
  0x2a   : > { %s184_s23 = sand.u32 (!%p179_p3), 1, %s2725_s10  }
  0x2b   : > { %182 = sbr.rel (%p179_p3) target bundleno = 610 (0x262), region = 28  ;;  %s185_s25 = scalar_lea.sflag (!%p179_p3), [#allocation3], %s184_s23 }
  0x2c   : > { %s2601_s24 = smul.u32 (!%p179_p3), 2304, %s184_s23 }
  0x2e   : > { %s2853_s28 = scalar_lea.vmem (!%p179_p3), [#allocation2], %s2601_s24 }
  0x32   : > { %2716 = dma.done.wait (%p2801_p7), %s185_s25, 36864  }
  0x33   : > { %2718 = vsyncadd (%p2801_p7), %s185_s25, 4294930432  ;;  %s2081_s27 = sshll.u32 %s2733_s12, 1  ;;  %v2746_v0 = vmov 0.0|0.0   ;;  %v253_v1 = vld [vmem:[%s2853_s28 + $0x10] sm:$0xff]  ;;  %v252_v46 = vld [vmem:[%s2853_s28 + $0x8] sm:$0xff]  ;;  %vm1855_vm0 = vcmask 523264  }
  0x34   : > { %2423 = vmatprep.subr.bf16.mxu0 %v2746_v0  ;;  %p229_p9 = scmp.lt.s32.totalorder %s2081_s27, 11  ;;  %2247 = vmatprep.mubr.f32.mxu1 %v253_v1  ;;  %v256_v58 = vld [vmem:[%s2853_s28 + $0x28] sm:$0xff]  ;;  %v259_v60 = vld [vmem:[%s2853_s28 + $0x40] sm:$0xff] }
  0x35   : > { %699 = vmatprep.mubr.f32.mxu0 %v252_v46 }
  0x36   : > { %s3834_s27 = smov (!%p229_p9, %s2081_s27), 11 }
  0x37   : > { %s2602_s26 = smul.u32 384, %s3834_s27 }
  0x39   : > { %s2869_s3 = scalar_lea.vmem %s3822_s1, %s2602_s26  ;;  %s3315_s4 = scalar_lea.vmem %s3823_s2, %s2602_s26 }
  0x3a   : > { %v539_v2 = vld [vmem:[%s2869_s3] sm:$0xff]  ;;  %v540_v3 = vld [vmem:[%s2869_s3 + $0x8] sm:$0xff]  ;;  %v541_v7 = vld [vmem:[%s2869_s3 + $0x10] sm:$0xff] }
  0x3b   : > { %v571_v4 = vld [vmem:[%s2869_s3 + $0x100] sm:$0xff]  ;;  %v2424_v5 = vpack.c.bf16 %v540_v3, %v539_v2  ;;  %v572_v6 = vld [vmem:[%s2869_s3 + $0x108] sm:$0xff]  ;;  %v542_v8 = vld [vmem:[%s2869_s3 + $0x18] sm:$0xff] }
  0x3c   : > { %v2471_v9 = vpack.c.bf16 %v572_v6, %v571_v4  ;;  %v573_v10 = vld [vmem:[%s2869_s3 + $0x110] sm:$0xff]  ;;  %v574_v11 = vld [vmem:[%s2869_s3 + $0x118] sm:$0xff]  ;;  %v2427_v12 = vpack.c.bf16 %v542_v8, %v541_v7  ;;  %v575_v14 = vld [vmem:[%s2869_s3 + $0x120] sm:$0xff] }
  0x3d   : > { %2425 = vmatpush1.bf16.msra.mxu0 %v2424_v5  ;;  %v2475_v13 = vpack.c.bf16 %v574_v11, %v573_v10  ;;  %v576_v15 = vld [vmem:[%s2869_s3 + $0x128] sm:$0xff]  ;;  %v543_v16 = vld [vmem:[%s2869_s3 + $0x20] sm:$0xff]  ;;  %v577_v20 = vld [vmem:[%s2869_s3 + $0x130] sm:$0xff] }
  0x3e   : > { %2472 = vmatprep.subr.bf16.mxu1 %v2471_v9  ;;  %2426 = vmatprep.subr.bf16.mxu0 %v2746_v0  ;;  %v544_v17 = vld [vmem:[%s2869_s3 + $0x28] sm:$0xff]  ;;  %v2479_v18 = vpack.c.bf16 %v576_v15, %v575_v14  ;;  %v578_v21 = vld [vmem:[%s2869_s3 + $0x138] sm:$0xff]  ;;  %v545_v22 = vld [vmem:[%s2869_s3 + $0x30] sm:$0xff] }
  0x3f   : > { %2474 = vmatpush3.bf16.msra.mxu1 %v2471_v9  ;;  %v2430_v19 = vpack.c.bf16 %v544_v17, %v543_v16  ;;  %v546_v23 = vld [vmem:[%s2869_s3 + $0x38] sm:$0xff]  ;;  %v2483_v24 = vpack.c.bf16 %v578_v21, %v577_v20  ;;  %v579_v26 = vld [vmem:[%s2869_s3 + $0x140] sm:$0xff]  ;;  %v580_v27 = vld [vmem:[%s2869_s3 + $0x148] sm:$0xff] }
  0x40   : > { %2476 = vmatprep.subr.bf16.mxu1 %v2475_v13  ;;  %v2433_v25 = vpack.c.bf16 %v546_v23, %v545_v22  ;;  %v547_v28 = vld [vmem:[%s2869_s3 + $0x40] sm:$0xff]  ;;  %v548_v29 = vld [vmem:[%s2869_s3 + $0x48] sm:$0xff]  ;;  %v2487_v30 = vpack.c.bf16 %v580_v27, %v579_v26  ;;  %v581_v32 = vld [vmem:[%s2869_s3 + $0x150] sm:$0xff] }
  0x41   : > { %2428 = vmatpush1.bf16.msra.mxu0 %v2427_v12  ;;  %v2436_v31 = vpack.c.bf16 %v548_v29, %v547_v28  ;;  %v582_v33 = vld [vmem:[%s2869_s3 + $0x158] sm:$0xff]  ;;  %v549_v34 = vld [vmem:[%s2869_s3 + $0x50] sm:$0xff]  ;;  %v583_v38 = vld [vmem:[%s2869_s3 + $0x160] sm:$0xff] }
  0x42   : > { %2429 = vmatprep.subr.bf16.mxu0 %v2746_v0  ;;  %v550_v35 = vld [vmem:[%s2869_s3 + $0x58] sm:$0xff]  ;;  %v2491_v36 = vpack.c.bf16 %v582_v33, %v581_v32  ;;  %v584_v39 = vld [vmem:[%s2869_s3 + $0x168] sm:$0xff]  ;;  %v551_v40 = vld [vmem:[%s2869_s3 + $0x60] sm:$0xff] }
  0x43   : > { %2478 = vmatpush3.bf16.msra.mxu1 %v2475_v13  ;;  %v2439_v37 = vpack.c.bf16 %v550_v35, %v549_v34  ;;  %v552_v41 = vld [vmem:[%s2869_s3 + $0x68] sm:$0xff]  ;;  %v2495_v42 = vpack.c.bf16 %v584_v39, %v583_v38  ;;  %v585_v44 = vld [vmem:[%s2869_s3 + $0x170] sm:$0xff]  ;;  %v586_v45 = vld [vmem:[%s2869_s3 + $0x178] sm:$0xff] }
  0x44   : > { %2480 = vmatprep.subr.bf16.mxu1 %v2479_v18  ;;  %v2442_v43 = vpack.c.bf16 %v552_v41, %v551_v40  ;;  %v553_v47 = vld [vmem:[%s2869_s3 + $0x70] sm:$0xff]  ;;  %v554_v48 = vld [vmem:[%s2869_s3 + $0x78] sm:$0xff]  ;;  %v2499_v49 = vpack.c.bf16 %v586_v45, %v585_v44  ;;  %v555_v51 = vld [vmem:[%s2869_s3 + $0x80] sm:$0xff] }
  0x45   : > { %2431 = vmatpush1.bf16.msra.mxu0 %v2430_v19  ;;  %v2445_v50 = vpack.c.bf16 %v554_v48, %v553_v47  ;;  %v556_v52 = vld [vmem:[%s2869_s3 + $0x88] sm:$0xff]  ;;  %v587_v53 = vld [vmem:[%s2869_s3 + $0x180] sm:$0xff]  ;;  %v557_v56 = vld [vmem:[%s2869_s3 + $0x90] sm:$0xff] }
  0x46   : > { %2432 = vmatprep.subr.bf16.mxu0 %v2746_v0  ;;  %v588_v54 = vld [vmem:[%s2869_s3 + $0x188] sm:$0xff]  ;;  %v2448_v55 = vpack.c.bf16 %v556_v52, %v555_v51  ;;  %v558_v57 = vld [vmem:[%s2869_s3 + $0x98] sm:$0xff]  ;;  %v589_v61 = vld [vmem:[%s2869_s3 + $0x190] sm:$0xff] }
  0x47   : > { %2482 = vmatpush3.bf16.msra.mxu1 %v2479_v18  ;;  %v2504_v59 = vpack.c.bf16 %v588_v54, %v587_v53  ;;  %v590_v62 = vld [vmem:[%s2869_s3 + $0x198] sm:$0xff]  ;;  %v2451_v63 = vpack.c.bf16 %v558_v57, %v557_v56  ;;  %v559_v1 = vld [vmem:[%s2869_s3 + $0xa0] sm:$0xff]  ;;  %v560_v2 = vld [vmem:[%s2869_s3 + $0xa8] sm:$0xff] }
  0x48   : > { %2484 = vmatprep.subr.bf16.mxu1 %v2483_v24  ;;  %v262_v3 = vld [vmem:[%s2853_s28 + $0x58] sm:$0xff]  ;;  %v2507_v4 = vpack.c.bf16 %v590_v62, %v589_v61  ;;  %v265_v5 = vld [vmem:[%s2853_s28 + $0x70] sm:$0xff]  ;;  %v591_v6 = vld [vmem:[%s2869_s3 + $0x1a0] sm:$0xff]  ;;  %v2454_v8 = vpack.c.bf16 %v560_v2, %v559_v1 }
  0x49   : > { %2434 = vmatpush1.bf16.msra.mxu0 %v2433_v25  ;;  %v592_v7 = vld [vmem:[%s2869_s3 + $0x1a8] sm:$0xff]  ;;  %v561_v9 = vld [vmem:[%s2869_s3 + $0xb0] sm:$0xff]  ;;  %v562_v10 = vld [vmem:[%s2869_s3 + $0xb8] sm:$0xff] }
  0x4a   : > { %2435 = vmatprep.subr.bf16.mxu0 %v2746_v0  ;;  %v268_v11 = vld [vmem:[%s2853_s28 + $0x88] sm:$0xff]  ;;  %v2510_v12 = vpack.c.bf16 %v592_v7, %v591_v6  ;;  %v271_v13 = vld [vmem:[%s2853_s28 + $0xa0] sm:$0xff]  ;;  %v593_v14 = vld [vmem:[%s2869_s3 + $0x1b0] sm:$0xff]  ;;  %v2457_v16 = vpack.c.bf16 %v562_v10, %v561_v9 }
  0x4b   : > { %2486 = vmatpush3.bf16.msra.mxu1 %v2483_v24  ;;  %v594_v15 = vld [vmem:[%s2869_s3 + $0x1b8] sm:$0xff]  ;;  %v563_v17 = vld [vmem:[%s2869_s3 + $0xc0] sm:$0xff]  ;;  %v564_v18 = vld [vmem:[%s2869_s3 + $0xc8] sm:$0xff] }
  0x4c   : > { %2488 = vmatprep.subr.bf16.mxu1 %v2487_v30  ;;  %v274_v19 = vld [vmem:[%s2853_s28 + $0xb8] sm:$0xff]  ;;  %v2513_v20 = vpack.c.bf16 %v594_v15, %v593_v14  ;;  %v277_v21 = vld [vmem:[%s2853_s28 + $0xd0] sm:$0xff]  ;;  %v595_v22 = vld [vmem:[%s2869_s3 + $0x1c0] sm:$0xff]  ;;  %v2460_v24 = vpack.c.bf16 %v564_v18, %v563_v17 }
  0x4d   : > { %2437 = vmatpush1.bf16.msra.mxu0 %v2436_v31  ;;  %v596_v23 = vld [vmem:[%s2869_s3 + $0x1c8] sm:$0xff]  ;;  %v565_v25 = vld [vmem:[%s2869_s3 + $0xd0] sm:$0xff]  ;;  %v566_v26 = vld [vmem:[%s2869_s3 + $0xd8] sm:$0xff] }
  0x4e   : > { %2438 = vmatprep.subr.bf16.mxu0 %v2746_v0  ;;  %v280_v27 = vld [vmem:[%s2853_s28 + $0xe8] sm:$0xff]  ;;  %v2516_v28 = vpack.c.bf16 %v596_v23, %v595_v22  ;;  %v283_v29 = vld [vmem:[%s2853_s28 + $0x100] sm:$0xff]  ;;  %v598_v31 = vld [vmem:[%s2869_s3 + $0x1d8] sm:$0xff]  ;;  %v2463_v32 = vpack.c.bf16 %v566_v26, %v565_v25 }
  0x4f   : > { %2490 = vmatpush3.bf16.msra.mxu1 %v2487_v30  ;;  %v597_v30 = vld [vmem:[%s2869_s3 + $0x1d0] sm:$0xff]  ;;  %v567_v33 = vld [vmem:[%s2869_s3 + $0xe0] sm:$0xff]  ;;  %v568_v34 = vld [vmem:[%s2869_s3 + $0xe8] sm:$0xff] }
  0x50   : > { %2492 = vmatprep.subr.bf16.mxu1 %v2491_v36  ;;  %v286_v35 = vld [vmem:[%s2853_s28 + $0x118] sm:$0xff]  ;;  %v599_v38 = vld [vmem:[%s2869_s3 + $0x1e0] sm:$0xff]  ;;  %v600_v39 = vld [vmem:[%s2869_s3 + $0x1e8] sm:$0xff]  ;;  %v2466_v40 = vpack.c.bf16 %v568_v34, %v567_v33 }
  0x51   : > { %2440 = vmatpush1.bf16.msra.mxu0 %v2439_v37  ;;  %v289_v37 = vld [vmem:[%s2853_s28 + $0x130] sm:$0xff]  ;;  %v619_v44 = vld [vmem:[%s2869_s3 + $0x280] sm:$0xff]  ;;  %v620_v45 = vld [vmem:[%s2869_s3 + $0x288] sm:$0xff]  ;;  %v2522_v46 = vpack.c.bf16 %v600_v39, %v599_v38 }
  0x52   : > { %2441 = vmatprep.subr.bf16.mxu0 %v2746_v0  ;;  %v569_v41 = vld [vmem:[%s2869_s3 + $0xf0] sm:$0xff]  ;;  %v295_v47 = vld [vmem:[%s2853_s28 + $0x160] sm:$0xff]  ;;  %v2975_v51 = vpack.c.bf16 %v620_v45, %v619_v44  ;;  %v298_v52 = vld [vmem:[%s2853_s28 + $0x178] sm:$0xff] }
  0x53   : > { %2494 = vmatpush3.bf16.msra.mxu1 %v2491_v36  ;;  %v2519_v36 = vpack.c.bf16 %v598_v31, %v597_v30  ;;  %v601_v48 = vld [vmem:[%s2869_s3 + $0x1f0] sm:$0xff]  ;;  %v603_v57 = vld [vmem:[%s2869_s3 + $0x200] sm:$0xff]  ;;  %v304_v62 = vld [vmem:[%s2853_s28 + $0x1a8] sm:$0xff] }
  0x54   : > { %2496 = vmatprep.subr.bf16.mxu1 %v2495_v42  ;;  %v621_v54 = vld [vmem:[%s2869_s3 + $0x290] sm:$0xff]  ;;  %v623_v1 = vld [vmem:[%s2869_s3 + $0x2a0] sm:$0xff]  ;;  %v624_v2 = vld [vmem:[%s2869_s3 + $0x2a8] sm:$0xff] }
  0x55   : > { %2443 = vmatpush1.bf16.msra.mxu0 %v2442_v43  ;;  %v292_v43 = vld [vmem:[%s2853_s28 + $0x148] sm:$0xff]  ;;  %v301_v56 = vld [vmem:[%s2853_s28 + $0x190] sm:$0xff]  ;;  %v254_v6 = vld [vmem:[%s2853_s28 + $0x18] sm:$0xff] }
  0x56   : > { %2444 = vmatprep.subr.bf16.mxu0 %v2746_v0  ;;  %v258_v7 = vld [vmem:[%s2853_s28 + $0x38] sm:$0xff]  ;;  %v607_v14 = vld [vmem:[%s2869_s3 + $0x220] sm:$0xff]  ;;  %v608_v15 = vld [vmem:[%s2869_s3 + $0x228] sm:$0xff] }
  0x57   : > { %2498 = vmatpush3.bf16.msra.mxu1 %v2495_v42  ;;  %v570_v42 = vld [vmem:[%s2869_s3 + $0xf8] sm:$0xff]  ;;  %v261_v17 = vld [vmem:[%s2853_s28 + $0x50] sm:$0xff]  ;;  %v628_v22 = vld [vmem:[%s2869_s3 + $0x2c8] sm:$0xff] }
  0x58   : > { %2500 = vmatprep.subr.bf16.mxu1 %v2499_v49  ;;  %v310_v9 = vld [vmem:[%s2853_s28 + $0x1d8] sm:$0xff]  ;;  %v319_v23 = vld [vmem:[%s2853_s28 + $0x220] sm:$0xff]  ;;  %v260_v26 = vld [vmem:[%s2853_s28 + $0x48] sm:$0xff] }
  0x59   : > { %2446 = vmatpush1.bf16.msra.mxu0 %v2445_v50  ;;  %v2469_v50 = vpack.c.bf16 %v570_v42, %v569_v41  ;;  %v610_v25 = vld [vmem:[%s2869_s3 + $0x238] sm:$0xff]  ;;  %v629_v31 = vld [vmem:[%s2869_s3 + $0x2d0] sm:$0xff]  ;;  %v611_v34 = vld [vmem:[%s2869_s3 + $0x240] sm:$0xff] }
  0x5a   : > { %2447 = vmatprep.subr.bf16.mxu0 %v2746_v0  ;;  %v325_v33 = vld [vmem:[%s2853_s28 + $0x250] sm:$0xff]  ;;  %v328_v39 = vld [vmem:[%s2853_s28 + $0x268] sm:$0xff]  ;;  %v331_v41 = vld [vmem:[%s2853_s28 + $0x280] sm:$0xff] }
  0x5b   : > { %2502 = vmatpush3.bf16.msra.mxu1 %v2499_v49  ;;  %v602_v49 = vld [vmem:[%s2869_s3 + $0x1f8] sm:$0xff]  ;;  %v613_v42 = vld [vmem:[%s2869_s3 + $0x250] sm:$0xff] }
  0x5c   : > { %2503 = vmatprep.subr.bf16.mxu1 %v2746_v0  ;;  %v2525_v53 = vpack.c.bf16 %v602_v49, %v601_v48  ;;  %v266_v44 = vld [vmem:[%s2853_s28 + $0x78] sm:$0xff] }
  0x5d   : > { %2449 = vmatpush1.bf16.msra.mxu0 %v2448_v55  ;;  %v622_v55 = vld [vmem:[%s2869_s3 + $0x298] sm:$0xff] }
  0x5e   : > { %2248 = vmatmul.mubr.f32.vlgmr.msra.gmra.mrb[0].mxu1 %v256_v58  ;;  %2450 = vmatprep.subr.bf16.mxu0 %v2746_v0  ;;  %v604_v58 = vld [vmem:[%s2869_s3 + $0x208] sm:$0xff]  ;;  %v2987_v61 = vpack.c.bf16 %v622_v55, %v621_v54  ;;  %v270_v45 = vld [vmem:[%s2853_s28 + $0x98] sm:$0xff]  ;;  %v269_v55 = vld [vmem:[%s2853_s28 + $0x90] sm:$0xff] }
  0x5f   : > { %2505 = vmatpush1.bf16.msra.mxu1 %v2504_v59  ;;  %2250 = vmatprep.mubr.f32.mxu1 %v259_v60  ;;  %v251_v59 = vld [vmem:[%s2853_s28] sm:$0xff]  ;;  %v334_v48 = vld [vmem:[%s2853_s28 + $0x298] sm:$0xff]  ;;  %v616_v54 = vld [vmem:[%s2869_s3 + $0x268] sm:$0xff] }
  0x60   : > { %2506 = vmatprep.subr.bf16.mxu1 %v2746_v0  ;;  %v255_v60 = vld [vmem:[%s2853_s28 + $0x20] sm:$0xff] }
  0x61   : > { %2452 = vmatpush1.bf16.msra.mxu0 %v2451_v63  ;;  %v2528_v63 = vpack.c.bf16 %v604_v58, %v603_v57  ;;  %v340_v57 = vld [vmem:[%s2853_s28 + $0x2c8] sm:$0xff] }
  0x62   : > { %2251 = vmatmul.mubr.f32.gmra.mrb[2].mxu1 %v262_v3  ;;  %2453 = vmatprep.subr.bf16.mxu0 %v2746_v0  ;;  %v307_v3 = vld [vmem:[%s2853_s28 + $0x1c0] sm:$0xff] }
  0x63   : > { %2253 = vmatprep.mubr.f32.mxu1 %v265_v5  ;;  %2508 = vmatpush1.bf16.msra.mxu1 %v2507_v4  ;;  %v605_v4 = vld [vmem:[%s2869_s3 + $0x210] sm:$0xff]  ;;  %v606_v5 = vld [vmem:[%s2869_s3 + $0x218] sm:$0xff] }
  0x64   : > { %2509 = vmatprep.subr.bf16.mxu1 %v2746_v0  ;;  %v2531_v10 = vpack.c.bf16 %v606_v5, %v605_v4  ;;  %v349_v4 = vld [vmem:[%s2853_s28 + $0x310] sm:$0xff]  ;;  %v275_v5 = vld [vmem:[%s2853_s28 + $0xc0] sm:$0xff] }
  0x65   : > { %2455 = vmatpush1.bf16.msra.mxu0 %v2454_v8  ;;  %v3000_v8 = vpack.c.bf16 %v624_v2, %v623_v1  ;;  %v276_v1 = vld [vmem:[%s2853_s28 + $0xc8] sm:$0xff]  ;;  %v346_v2 = vld [vmem:[%s2853_s28 + $0x2f8] sm:$0xff] }
  0x66   : > { %2254 = vmatmul.mubr.f32.gmra.mrb[4].mxu1 %v268_v11  ;;  %2456 = vmatprep.subr.bf16.mxu0 %v2746_v0  ;;  %v625_v11 = vld [vmem:[%s2869_s3 + $0x2b0] sm:$0xff] }
  0x67   : > { %2256 = vmatprep.mubr.f32.mxu1 %v271_v13  ;;  %2511 = vmatpush1.bf16.msra.mxu1 %v2510_v12  ;;  %v626_v12 = vld [vmem:[%s2869_s3 + $0x2b8] sm:$0xff]  ;;  %v313_v13 = vld [vmem:[%s2853_s28 + $0x1f0] sm:$0xff] }
  0x68   : > { %2512 = vmatprep.subr.bf16.mxu1 %v2746_v0  ;;  %v3013_v18 = vpack.c.bf16 %v626_v12, %v625_v11  ;;  %v358_v11 = vld [vmem:[%s2853_s28 + $0x358] sm:$0xff]  ;;  %v361_v12 = vld [vmem:[%s2853_s28 + $0x370] sm:$0xff] }
  0x69   : > { %2458 = vmatpush1.bf16.msra.mxu0 %v2457_v16  ;;  %v257_v16 = vld [vmem:[%s2853_s28 + $0x30] sm:$0xff] }
  0x6a   : > { %2257 = vmatmul.mubr.f32.gmra.mrb[6].mxu1 %v274_v19  ;;  %2459 = vmatprep.subr.bf16.mxu0 %v2746_v0  ;;  %v316_v19 = vld [vmem:[%s2853_s28 + $0x208] sm:$0xff] }
  0x6b   : > { %2259 = vmatprep.mubr.f32.mxu1 %v277_v21  ;;  %2514 = vmatpush1.bf16.msra.mxu1 %v2513_v20  ;;  %v2534_v20 = vpack.c.bf16 %v608_v15, %v607_v14  ;;  %v627_v21 = vld [vmem:[%s2869_s3 + $0x2c0] sm:$0xff]  ;;  %v285_v14 = vld [vmem:[%s2853_s28 + $0x110] sm:$0xff]  ;;  %v364_v15 = vld [vmem:[%s2853_s28 + $0x388] sm:$0xff] }
  0x6c   : > { %2515 = vmatprep.subr.bf16.mxu1 %v2746_v0 }
  0x6d   : > { %2461 = vmatpush1.bf16.msra.mxu0 %v2460_v24  ;;  %v609_v24 = vld [vmem:[%s2869_s3 + $0x230] sm:$0xff] }
  0x6e   : > { %2260 = vmatmul.mubr.f32.gmra.mrb[8].mxu1 %v280_v27  ;;  %2462 = vmatprep.subr.bf16.mxu0 %v2746_v0  ;;  %v264_v27 = vld [vmem:[%s2853_s28 + $0x68] sm:$0xff]  ;;  %v2537_v30 = vpack.c.bf16 %v610_v25, %v609_v24  ;;  %v373_v24 = vld [vmem:[%s2853_s28 + $0x3d0] sm:$0xff]  ;;  %v287_v25 = vld [vmem:[%s2853_s28 + $0x120] sm:$0xff] }
  0x6f   : > { %2262 = vmatprep.mubr.f32.mxu1 %v283_v29  ;;  %2517 = vmatpush1.bf16.msra.mxu1 %v2516_v28  ;;  %v3026_v28 = vpack.c.bf16 %v628_v22, %v627_v21  ;;  %v322_v29 = vld [vmem:[%s2853_s28 + $0x238] sm:$0xff] }
  0x70   : > { %2518 = vmatprep.subr.bf16.mxu1 %v2746_v0  ;;  %v634_v21 = vld [vmem:[%s2869_s3 + $0x2f8] sm:$0xff] }
  0x71   : > { %2464 = vmatpush1.bf16.msra.mxu0 %v2463_v32  ;;  %v630_v32 = vld [vmem:[%s2869_s3 + $0x2d8] sm:$0xff] }
  0x72   : > { %2263 = vmatmul.mubr.f32.gmra.mrb[10].mxu1 %v286_v35  ;;  %2465 = vmatprep.subr.bf16.mxu0 %v2746_v0  ;;  %v612_v35 = vld [vmem:[%s2869_s3 + $0x248] sm:$0xff]  ;;  %v3039_v38 = vpack.c.bf16 %v630_v32, %v629_v31  ;;  %v370_v22 = vld [vmem:[%s2853_s28 + $0x3b8] sm:$0xff] }
  0x73   : > { %2265 = vmatprep.mubr.f32.mxu1 %v289_v37  ;;  %2520 = vmatpush1.bf16.msra.mxu1 %v2519_v36  ;;  %v263_v36 = vld [vmem:[%s2853_s28 + $0x60] sm:$0xff]  ;;  %v294_v31 = vld [vmem:[%s2853_s28 + $0x158] sm:$0xff] }
  0x74   : > { %2521 = vmatprep.subr.bf16.mxu1 %v2746_v0  ;;  %v267_v37 = vld [vmem:[%s2853_s28 + $0x80] sm:$0xff]  ;;  %v382_v32 = vld [vmem:[%s2853_s28 + $0x418] sm:$0xff] }
  0x75   : > { %2467 = vmatpush1.bf16.msra.mxu0 %v2466_v40  ;;  %v2540_v40 = vpack.c.bf16 %v612_v35, %v611_v34  ;;  %v293_v34 = vld [vmem:[%s2853_s28 + $0x150] sm:$0xff] }
  0x76   : > { %2266 = vmatmul.mubr.f32.gmra.mrb[12].mxu1 %v292_v43  ;;  %2468 = vmatprep.subr.bf16.mxu0 %v2746_v0  ;;  %v614_v43 = vld [vmem:[%s2869_s3 + $0x258] sm:$0xff]  ;;  %v297_v35 = vld [vmem:[%s2853_s28 + $0x170] sm:$0xff] }
  0x77   : > { %2268 = vmatprep.mubr.f32.mxu1 %v295_v47  ;;  %2523 = vmatpush1.bf16.msra.mxu1 %v2522_v46  ;;  %v631_v46 = vld [vmem:[%s2869_s3 + $0x2e0] sm:$0xff]  ;;  %v632_v47 = vld [vmem:[%s2869_s3 + $0x2e8] sm:$0xff]  ;;  %v2543_v49 = vpack.c.bf16 %v614_v43, %v613_v42 }
  0x78   : > { %2524 = vmatprep.subr.bf16.mxu1 %v2746_v0  ;;  %v396_v42 = vld [vmem:[%s2853_s28 + $0x488] sm:$0xff]  ;;  %v299_v43 = vld [vmem:[%s2853_s28 + $0x180] sm:$0xff] }
  0x79   : > { %2470 = vmatpush1.bf16.msra.mxu0 %v2469_v50  ;;  %v3053_v50 = vpack.c.bf16 %v632_v47, %v631_v46  ;;  %v399_v46 = vld [vmem:[%s2853_s28 + $0x4a0] sm:$0xff]  ;;  %v302_v47 = vld [vmem:[%s2853_s28 + $0x198] sm:$0xff] }
  0x7a   : > { %2269 = vmatmul.mubr.f32.gmra.mrb[14].mxu1 %v298_v52  ;;  %2552 = vmatprep.subr.bf16.mxu0 %v2975_v51  ;;  %v337_v52 = vld [vmem:[%s2853_s28 + $0x2b0] sm:$0xff] }
  0x7b   : > { %2271 = vmatprep.mubr.f32.mxu1 %v301_v56  ;;  %2526 = vmatpush1.bf16.msra.mxu1 %v2525_v53  ;;  %v615_v53 = vld [vmem:[%s2869_s3 + $0x260] sm:$0xff]  ;;  %v273_v56 = vld [vmem:[%s2853_s28 + $0xb0] sm:$0xff] }
  0x7c   : > { %700 = vmatmul.mubr.f32.vlgmr.msra.gmra.mrb[0].mxu0 %v251_v59  ;;  %2527 = vmatprep.subr.bf16.mxu1 %v2746_v0  ;;  %v2546_v58 = vpack.c.bf16 %v616_v54, %v615_v53  ;;  %v343_v59 = vld [vmem:[%s2853_s28 + $0x2e0] sm:$0xff]  ;;  %v305_v53 = vld [vmem:[%s2853_s28 + $0x1b0] sm:$0xff] }
  0x7d   : > { %2554 = vmatpush3.bf16.msra.mxu0 %v2975_v51  ;;  %704 = vmatprep.mubr.f32.mxu0 %v255_v60  ;;  %v617_v60 = vld [vmem:[%s2869_s3 + $0x270] sm:$0xff] }
  0x7e   : > { %2272 = vmatmul.mubr.f32.gmra.mrb[16].mxu1 %v304_v62  ;;  %2556 = vmatprep.subr.bf16.mxu0 %v2987_v61  ;;  %v618_v62 = vld [vmem:[%s2869_s3 + $0x278] sm:$0xff]  ;;  %v309_v54 = vld [vmem:[%s2853_s28 + $0x1d0] sm:$0xff] }
  0x7f   : > { %2274 = vmatprep.mubr.f32.mxu1 %v307_v3  ;;  %2529 = vmatpush1.bf16.msra.mxu1 %v2528_v63  ;;  %v272_v63 = vld [vmem:[%s2853_s28 + $0xa8] sm:$0xff]  ;;  %v2549_v3 = vpack.c.bf16 %v618_v62, %v617_v60  ;;  %v315_v60 = vld [vmem:[%s2853_s28 + $0x200] sm:$0xff] }
  0x80   : > { %705 = vmatmul.mubr.f32.gmra.mrb[2].mxu0 %v254_v6  ;;  %2530 = vmatprep.subr.bf16.mxu1 %v2746_v0  ;;  %v279_v6 = vld [vmem:[%s2853_s28 + $0xe0] sm:$0xff] }
  0x81   : > { %709 = vmatprep.mubr.f32.mxu0 %v258_v7  ;;  %2558 = vmatpush3.bf16.msra.mxu0 %v2987_v61  ;;  %v352_v7 = vld [vmem:[%s2853_s28 + $0x328] sm:$0xff]  ;;  %v407_v62 = vld [vmem:[%s2853_s28 + $0x4e0] sm:$0xff] }
  0x82   : > { %2275 = vmatmul.mubr.f32.gmra.mrb[18].mxu1 %v310_v9  ;;  %2560 = vmatprep.subr.bf16.mxu0 %v3000_v8  ;;  %v355_v9 = vld [vmem:[%s2853_s28 + $0x340] sm:$0xff] }
  0x83   : > { %2277 = vmatprep.mubr.f32.mxu1 %v313_v13  ;;  %2532 = vmatpush1.bf16.msra.mxu1 %v2531_v10  ;;  %v278_v10 = vld [vmem:[%s2853_s28 + $0xd8] sm:$0xff]  ;;  %v281_v13 = vld [vmem:[%s2853_s28 + $0xf0] sm:$0xff] }
  0x84   : > { %710 = vmatmul.mubr.f32.gmra.mrb[4].mxu0 %v257_v16  ;;  %2533 = vmatprep.subr.bf16.mxu1 %v2746_v0  ;;  %v367_v16 = vld [vmem:[%s2853_s28 + $0x3a0] sm:$0xff] }
  0x85   : > { %714 = vmatprep.mubr.f32.mxu0 %v261_v17  ;;  %2562 = vmatpush3.bf16.msra.mxu0 %v3000_v8  ;;  %v284_v17 = vld [vmem:[%s2853_s28 + $0x108] sm:$0xff] }
  0x86   : > { %2278 = vmatmul.mubr.f32.gmra.mrb[20].mxu1 %v316_v19  ;;  %2564 = vmatprep.subr.bf16.mxu0 %v3013_v18  ;;  %v288_v19 = vld [vmem:[%s2853_s28 + $0x128] sm:$0xff] }
  0x87   : > { %2280 = vmatprep.mubr.f32.mxu1 %v319_v23  ;;  %2535 = vmatpush1.bf16.msra.mxu1 %v2534_v20  ;;  %v633_v20 = vld [vmem:[%s2869_s3 + $0x2f0] sm:$0xff] }
  0x88   : > { %715 = vmatmul.mubr.f32.gmra.mrb[6].mxu0 %v260_v26  ;;  %2536 = vmatprep.subr.bf16.mxu1 %v2746_v0  ;;  %v3092_v23 = vpack.c.bf16 %v634_v21, %v633_v20  ;;  %v291_v26 = vld [vmem:[%s2853_s28 + $0x140] sm:$0xff]  ;;  %v429_v20 = vld [vmem:[%s2853_s28 + $0x590] sm:$0xff]  ;;  %v332_v21 = vld [vmem:[%s2853_s28 + $0x288] sm:$0xff] }
  0x89   : > { %719 = vmatprep.mubr.f32.mxu0 %v264_v27  ;;  %2566 = vmatpush3.bf16.msra.mxu0 %v3013_v18  ;;  %v376_v27 = vld [vmem:[%s2853_s28 + $0x3e8] sm:$0xff] }
  0x8a   : > { %2281 = vmatmul.mubr.f32.gmra.mrb[22].mxu1 %v322_v29  ;;  %2568 = vmatprep.subr.bf16.mxu0 %v3026_v28  ;;  %v379_v29 = vld [vmem:[%s2853_s28 + $0x400] sm:$0xff] }
  0x8b   : > { %2283 = vmatprep.mubr.f32.mxu1 %v325_v33  ;;  %2538 = vmatpush1.bf16.msra.mxu1 %v2537_v30  ;;  %v290_v30 = vld [vmem:[%s2853_s28 + $0x138] sm:$0xff]  ;;  %v385_v33 = vld [vmem:[%s2853_s28 + $0x430] sm:$0xff] }
  0x8c   : > { %720 = vmatmul.mubr.f32.gmra.mrb[8].mxu0 %v263_v36  ;;  %2539 = vmatprep.subr.bf16.mxu1 %v2746_v0  ;;  %v388_v36 = vld [vmem:[%s2853_s28 + $0x448] sm:$0xff] }
  0x8d   : > { %724 = vmatprep.mubr.f32.mxu0 %v267_v37  ;;  %2570 = vmatpush3.bf16.msra.mxu0 %v3026_v28  ;;  %v391_v37 = vld [vmem:[%s2853_s28 + $0x460] sm:$0xff] }
  0x8e   : > { %2284 = vmatmul.mubr.f32.gmra.mrb[24].mxu1 %v328_v39  ;;  %2572 = vmatprep.subr.bf16.mxu0 %v3039_v38  ;;  %v296_v39 = vld [vmem:[%s2853_s28 + $0x168] sm:$0xff] }
  0x8f   : > { %2286 = vmatprep.mubr.f32.mxu1 %v331_v41  ;;  %2541 = vmatpush1.bf16.msra.mxu1 %v2540_v40  ;;  %v300_v40 = vld [vmem:[%s2853_s28 + $0x188] sm:$0xff]  ;;  %v394_v41 = vld [vmem:[%s2853_s28 + $0x478] sm:$0xff] }
  0x90   : > { %725 = vmatmul.mubr.f32.gmra.mrb[10].mxu0 %v266_v44  ;;  %2542 = vmatprep.subr.bf16.mxu1 %v2746_v0  ;;  %v303_v44 = vld [vmem:[%s2853_s28 + $0x1a0] sm:$0xff] }
  0x91   : > { %729 = vmatprep.mubr.f32.mxu0 %v270_v45  ;;  %2574 = vmatpush3.bf16.msra.mxu0 %v3039_v38  ;;  %v395_v45 = vld [vmem:[%s2853_s28 + $0x480] sm:$0xff] }
  0x92   : > { %2287 = vmatmul.mubr.f32.gmra.mrb[26].mxu1 %v334_v48  ;;  %2576 = vmatprep.subr.bf16.mxu0 %v3053_v50  ;;  %v306_v48 = vld [vmem:[%s2853_s28 + $0x1b8] sm:$0xff] }
  0x93   : > { %2289 = vmatprep.mubr.f32.mxu1 %v337_v52  ;;  %2544 = vmatpush1.bf16.msra.mxu1 %v2543_v49  ;;  %v398_v49 = vld [vmem:[%s2853_s28 + $0x498] sm:$0xff] }
  0x94   : > { %730 = vmatmul.mubr.f32.gmra.mrb[12].mxu0 %v269_v55  ;;  %2545 = vmatprep.subr.bf16.mxu1 %v2746_v0  ;;  %v402_v52 = vld [vmem:[%s2853_s28 + $0x4b8] sm:$0xff]  ;;  %v401_v55 = vld [vmem:[%s2853_s28 + $0x4b0] sm:$0xff] }
  0x95   : > { %734 = vmatprep.mubr.f32.mxu0 %v273_v56  ;;  %2578 = vmatpush3.bf16.msra.mxu0 %v3053_v50  ;;  %v308_v56 = vld [vmem:[%s2853_s28 + $0x1c8] sm:$0xff] }
  0x96   : > { %2290 = vmatmul.mubr.f32.gmra.mrb[28].mxu1 %v340_v57  ;;  %2580 = vmatprep.subr.bf16.mxu0 %v3092_v23  ;;  %v312_v57 = vld [vmem:[%s2853_s28 + $0x1e8] sm:$0xff] }
  0x97   : > { %2292 = vmatprep.mubr.f32.mxu1 %v343_v59  ;;  %2547 = vmatpush1.bf16.msra.mxu1 %v2546_v58  ;;  %v404_v58 = vld [vmem:[%s2853_s28 + $0x4c8] sm:$0xff] }
  0x98   : > { %735 = vmatmul.mubr.f32.gmra.mrb[14].mxu0 %v272_v63  ;;  %2548 = vmatprep.subr.bf16.mxu1 %v2746_v0  ;;  %v282_v0 = vld [vmem:[%s2853_s28 + $0xf8] sm:$0xff]  ;;  %v408_v59 = vld [vmem:[%s2853_s28 + $0x4e8] sm:$0xff]  ;;  %v411_v63 = vld [vmem:[%s2853_s28 + $0x500] sm:$0xff] }
  0x99   : > { %739 = vmatprep.mubr.f32.mxu0 %v276_v1  ;;  %2582 = vmatpush3.bf16.msra.mxu0 %v3092_v23  ;;  %v318_v1 = vld [vmem:[%s2853_s28 + $0x218] sm:$0xff] }
  0x9a   : > { %2293 = vmatmul.mubr.f32.gmra.mrb[30].mxu1 %v346_v2  ;;  %v410_v2 = vld [vmem:[%s2853_s28 + $0x4f8] sm:$0xff] }
  0x9b   : > { %2295 = vmatprep.mubr.f32.mxu1 %v349_v4  ;;  %2550 = vmatpush1.bf16.msra.mxu1 %v2549_v3  ;;  %v414_v3 = vld [vmem:[%s2853_s28 + $0x518] sm:$0xff]  ;;  %v321_v4 = vld [vmem:[%s2853_s28 + $0x230] sm:$0xff] }
  0x9c   : > { %740 = vmatmul.mubr.f32.gmra.mrb[16].mxu0 %v275_v5  ;;  %2583 = vmatprep.subr.bf16.mxu1 %v2975_v51  ;;  %v413_v5 = vld [vmem:[%s2853_s28 + $0x510] sm:$0xff] }
  0x9d   : > { %744 = vmatprep.mubr.f32.mxu0 %v279_v6  ;;  %v417_v6 = vld [vmem:[%s2853_s28 + $0x530] sm:$0xff] }
  0x9e   : > { %2296 = vmatmul.mubr.f32.gmra.mrb[32].mxu1 %v352_v7  ;;  %v324_v7 = vld [vmem:[%s2853_s28 + $0x248] sm:$0xff] }
  0x9f   : > { %2298 = vmatprep.mubr.f32.mxu1 %v355_v9  ;;  %v416_v9 = vld [vmem:[%s2853_s28 + $0x528] sm:$0xff] }
  0xa0   : > { %745 = vmatmul.mubr.f32.gmra.mrb[18].mxu0 %v278_v10  ;;  %v420_v10 = vld [vmem:[%s2853_s28 + $0x548] sm:$0xff] }
  0xa1   : > { %749 = vmatprep.mubr.f32.mxu0 %v282_v0  ;;  %v327_v0 = vld [vmem:[%s2853_s28 + $0x260] sm:$0xff] }
  0xa2   : > { %2299 = vmatmul.mubr.f32.gmra.mrb[34].mxu1 %v358_v11  ;;  %v419_v11 = vld [vmem:[%s2853_s28 + $0x540] sm:$0xff] }
  0xa3   : > { %2301 = vmatprep.mubr.f32.mxu1 %v361_v12  ;;  %v326_v12 = vld [vmem:[%s2853_s28 + $0x258] sm:$0xff] }
  0xa4   : > { %750 = vmatmul.mubr.f32.gmra.mrb[20].mxu0 %v281_v13  ;;  %v330_v13 = vld [vmem:[%s2853_s28 + $0x278] sm:$0xff] }
  0xa5   : > { %754 = vmatprep.mubr.f32.mxu0 %v285_v14  ;;  %v422_v14 = vld [vmem:[%s2853_s28 + $0x558] sm:$0xff] }
  0xa6   : > { %2302 = vmatmul.mubr.f32.gmra.mrb[36].mxu1 %v364_v15  ;;  %v426_v15 = vld [vmem:[%s2853_s28 + $0x578] sm:$0xff] }
  0xa7   : > { %2304 = vmatprep.mubr.f32.mxu1 %v367_v16  ;;  %v329_v16 = vld [vmem:[%s2853_s28 + $0x270] sm:$0xff] }
  0xa8   : > { %755 = vmatmul.mubr.f32.gmra.mrb[22].mxu0 %v284_v17  ;;  %v333_v17 = vld [vmem:[%s2853_s28 + $0x290] sm:$0xff] }
  0xa9   : > { %759 = vmatprep.mubr.f32.mxu0 %v288_v19  ;;  %v425_v19 = vld [vmem:[%s2853_s28 + $0x570] sm:$0xff] }
  0xaa   : > { %2305 = vmatmul.mubr.f32.gmra.mrb[38].mxu1 %v370_v22  ;;  %v336_v22 = vld [vmem:[%s2853_s28 + $0x2a8] sm:$0xff] }
  0xab   : > { %2307 = vmatprep.mubr.f32.mxu1 %v373_v24  ;;  %v432_v24 = vld [vmem:[%s2853_s28 + $0x5a8] sm:$0xff] }
  0xac   : > { %760 = vmatmul.mubr.f32.gmra.mrb[24].mxu0 %v287_v25  ;;  %v335_v25 = vld [vmem:[%s2853_s28 + $0x2a0] sm:$0xff] }
  0xad   : > { %764 = vmatprep.mubr.f32.mxu0 %v291_v26  ;;  %v339_v26 = vld [vmem:[%s2853_s28 + $0x2c0] sm:$0xff] }
  0xae   : > { %2308 = vmatmul.mubr.f32.gmra.mrb[40].mxu1 %v376_v27  ;;  %v431_v27 = vld [vmem:[%s2853_s28 + $0x5a0] sm:$0xff] }
  0xaf   : > { %2310 = vmatprep.mubr.f32.mxu1 %v379_v29  ;;  %v435_v29 = vld [vmem:[%s2853_s28 + $0x5c0] sm:$0xff] }
  0xb0   : > { %765 = vmatmul.mubr.f32.gmra.mrb[26].mxu0 %v290_v30  ;;  %v338_v30 = vld [vmem:[%s2853_s28 + $0x2b8] sm:$0xff] }
  0xb1   : > { %769 = vmatprep.mubr.f32.mxu0 %v294_v31  ;;  %v342_v31 = vld [vmem:[%s2853_s28 + $0x2d8] sm:$0xff] }
  0xb2   : > { %2311 = vmatmul.mubr.f32.gmra.mrb[42].mxu1 %v382_v32  ;;  %v434_v32 = vld [vmem:[%s2853_s28 + $0x5b8] sm:$0xff] }
  0xb3   : > { %2313 = vmatprep.mubr.f32.mxu1 %v385_v33  ;;  %v438_v33 = vld [vmem:[%s2853_s28 + $0x5d8] sm:$0xff] }
  0xb4   : > { %770 = vmatmul.mubr.f32.gmra.mrb[28].mxu0 %v293_v34  ;;  %v341_v34 = vld [vmem:[%s2853_s28 + $0x2d0] sm:$0xff] }
  0xb5   : > { %774 = vmatprep.mubr.f32.mxu0 %v297_v35  ;;  %v345_v35 = vld [vmem:[%s2853_s28 + $0x2f0] sm:$0xff] }
  0xb6   : > { %2314 = vmatmul.mubr.f32.gmra.mrb[44].mxu1 %v388_v36  ;;  %v437_v36 = vld [vmem:[%s2853_s28 + $0x5d0] sm:$0xff] }
  0xb7   : > { %2316 = vmatprep.mubr.f32.mxu1 %v391_v37  ;;  %v441_v37 = vld [vmem:[%s2853_s28 + $0x5f0] sm:$0xff] }
  0xb8   : > { %775 = vmatmul.mubr.f32.gmra.mrb[30].mxu0 %v296_v39  ;;  %v344_v39 = vld [vmem:[%s2853_s28 + $0x2e8] sm:$0xff] }
  0xb9   : > { %779 = vmatprep.mubr.f32.mxu0 %v300_v40  ;;  %v348_v40 = vld [vmem:[%s2853_s28 + $0x308] sm:$0xff] }
  0xba   : > { %2317 = vmatmul.mubr.f32.gmra.mrb[46].mxu1 %v394_v41  ;;  %v440_v41 = vld [vmem:[%s2853_s28 + $0x5e8] sm:$0xff] }
  0xbb   : > { %1309 = vmatprep.mubr.f32.mxu1 %v396_v42  ;;  %v444_v42 = vld [vmem:[%s2853_s28 + $0x608] sm:$0xff] }
  0xbc   : > { %780 = vmatmul.mubr.f32.gmra.mrb[32].mxu0 %v299_v43  ;;  %v347_v43 = vld [vmem:[%s2853_s28 + $0x300] sm:$0xff] }
  0xbd   : > { %784 = vmatprep.mubr.f32.mxu0 %v303_v44  ;;  %v351_v44 = vld [vmem:[%s2853_s28 + $0x320] sm:$0xff] }
  0xbe   : > { %1310 = vmatmul.mubr.f32.vlgmr.msra.gmra.mrb[48].mxu1 %v395_v45  ;;  %v443_v45 = vld [vmem:[%s2853_s28 + $0x600] sm:$0xff] }
  0xbf   : > { %2591 = vmatpush3.bf16.msra.mxu1 %v2975_v51  ;;  %1314 = vmatprep.mubr.f32.mxu1 %v399_v46  ;;  %v405_v51 = vld [vmem:[%s2853_s28 + $0x4d0] sm:$0xff]  ;;  %v447_v46 = vld [vmem:[%s2853_s28 + $0x620] sm:$0xff] }
  0xc0   : > { %785 = vmatmul.mubr.f32.gmra.mrb[34].mxu0 %v302_v47  ;;  %2584 = vmatprep.subr.bf16.mxu1 %v2987_v61  ;;  %v350_v47 = vld [vmem:[%s2853_s28 + $0x318] sm:$0xff] }
  0xc1   : > { %789 = vmatprep.mubr.f32.mxu0 %v306_v48  ;;  %v354_v48 = vld [vmem:[%s2853_s28 + $0x338] sm:$0xff] }
  0xc2   : > { %1315 = vmatmul.mubr.f32.gmra.mrb[50].mxu1 %v398_v49  ;;  %v446_v49 = vld [vmem:[%s2853_s28 + $0x618] sm:$0xff] }
  0xc3   : > { %1319 = vmatprep.mubr.f32.mxu1 %v402_v52  ;;  %2592 = vmatpush3.bf16.msra.mxu1 %v2987_v61  ;;  %v311_v61 = vld [vmem:[%s2853_s28 + $0x1e0] sm:$0xff]  ;;  %v450_v52 = vld [vmem:[%s2853_s28 + $0x638] sm:$0xff] }
  0xc4   : > { %790 = vmatmul.mubr.f32.gmra.mrb[36].mxu0 %v305_v53  ;;  %2585 = vmatprep.subr.bf16.mxu1 %v3000_v8  ;;  %v353_v53 = vld [vmem:[%s2853_s28 + $0x330] sm:$0xff] }
  0xc5   : > { %794 = vmatprep.mubr.f32.mxu0 %v309_v54  ;;  %v357_v54 = vld [vmem:[%s2853_s28 + $0x350] sm:$0xff] }
  0xc6   : > { %1320 = vmatmul.mubr.f32.gmra.mrb[52].mxu1 %v401_v55  ;;  %v449_v55 = vld [vmem:[%s2853_s28 + $0x630] sm:$0xff] }
  0xc7   : > { %1324 = vmatprep.mubr.f32.mxu1 %v405_v51  ;;  %2593 = vmatpush3.bf16.msra.mxu1 %v3000_v8  ;;  %v314_v8 = vld [vmem:[%s2853_s28 + $0x1f8] sm:$0xff]  ;;  %v453_v51 = vld [vmem:[%s2853_s28 + $0x650] sm:$0xff] }
  0xc8   : > { %795 = vmatmul.mubr.f32.gmra.mrb[38].mxu0 %v308_v56  ;;  %2586 = vmatprep.subr.bf16.mxu1 %v3013_v18  ;;  %v356_v56 = vld [vmem:[%s2853_s28 + $0x348] sm:$0xff] }
  0xc9   : > { %799 = vmatprep.mubr.f32.mxu0 %v312_v57  ;;  %v360_v57 = vld [vmem:[%s2853_s28 + $0x368] sm:$0xff] }
  0xca   : > { %1325 = vmatmul.mubr.f32.gmra.mrb[54].mxu1 %v404_v58  ;;  %v452_v58 = vld [vmem:[%s2853_s28 + $0x648] sm:$0xff] }
  0xcb   : > { %1329 = vmatprep.mubr.f32.mxu1 %v408_v59  ;;  %2594 = vmatpush3.bf16.msra.mxu1 %v3013_v18  ;;  %v317_v18 = vld [vmem:[%s2853_s28 + $0x210] sm:$0xff]  ;;  %v456_v59 = vld [vmem:[%s2853_s28 + $0x668] sm:$0xff] }
  0xcc   : > { %800 = vmatmul.mubr.f32.gmra.mrb[40].mxu0 %v311_v61  ;;  %2587 = vmatprep.subr.bf16.mxu1 %v3026_v28  ;;  %v359_v61 = vld [vmem:[%s2853_s28 + $0x360] sm:$0xff] }
  0xcd   : > { %804 = vmatprep.mubr.f32.mxu0 %v315_v60  ;;  %v363_v60 = vld [vmem:[%s2853_s28 + $0x380] sm:$0xff] }
  0xce   : > { %1330 = vmatmul.mubr.f32.gmra.mrb[56].mxu1 %v407_v62  ;;  %v455_v62 = vld [vmem:[%s2853_s28 + $0x660] sm:$0xff] }
  0xcf   : > { %1334 = vmatprep.mubr.f32.mxu1 %v411_v63  ;;  %2595 = vmatpush3.bf16.msra.mxu1 %v3026_v28  ;;  %v320_v28 = vld [vmem:[%s2853_s28 + $0x228] sm:$0xff]  ;;  %v459_v63 = vld [vmem:[%s2853_s28 + $0x680] sm:$0xff] }
  0xd0   : > { %805 = vmatmul.mubr.f32.gmra.mrb[42].mxu0 %v314_v8  ;;  %2588 = vmatprep.subr.bf16.mxu1 %v3039_v38  ;;  %v362_v8 = vld [vmem:[%s2853_s28 + $0x378] sm:$0xff] }
  0xd1   : > { %809 = vmatprep.mubr.f32.mxu0 %v318_v1  ;;  %v366_v1 = vld [vmem:[%s2853_s28 + $0x398] sm:$0xff] }
  0xd2   : > { %1335 = vmatmul.mubr.f32.gmra.mrb[58].mxu1 %v410_v2  ;;  %v458_v2 = vld [vmem:[%s2853_s28 + $0x678] sm:$0xff] }
  0xd3   : > { %1339 = vmatprep.mubr.f32.mxu1 %v414_v3  ;;  %2596 = vmatpush3.bf16.msra.mxu1 %v3039_v38  ;;  %v323_v38 = vld [vmem:[%s2853_s28 + $0x240] sm:$0xff]  ;;  %v462_v3 = vld [vmem:[%s2853_s28 + $0x698] sm:$0xff] }
  0xd4   : > { %810 = vmatmul.mubr.f32.gmra.mrb[44].mxu0 %v317_v18  ;;  %2589 = vmatprep.subr.bf16.mxu1 %v3053_v50  ;;  %v365_v18 = vld [vmem:[%s2853_s28 + $0x390] sm:$0xff] }
  0xd5   : > { %814 = vmatprep.mubr.f32.mxu0 %v321_v4  ;;  %v369_v4 = vld [vmem:[%s2853_s28 + $0x3b0] sm:$0xff] }
  0xd6   : > { %1340 = vmatmul.mubr.f32.gmra.mrb[60].mxu1 %v413_v5  ;;  %v461_v5 = vld [vmem:[%s2853_s28 + $0x690] sm:$0xff] }
  0xd7   : > { %1344 = vmatprep.mubr.f32.mxu1 %v417_v6  ;;  %2597 = vmatpush3.bf16.msra.mxu1 %v3053_v50  ;;  %v423_v50 = vld [vmem:[%s2853_s28 + $0x560] sm:$0xff]  ;;  %v465_v6 = vld [vmem:[%s2853_s28 + $0x6b0] sm:$0xff] }
  0xd8   : > { %815 = vmatmul.mubr.f32.gmra.mrb[46].mxu0 %v320_v28  ;;  %2590 = vmatprep.subr.bf16.mxu1 %v3092_v23  ;;  %v368_v28 = vld [vmem:[%s2853_s28 + $0x3a8] sm:$0xff] }
  0xd9   : > { %819 = vmatprep.mubr.f32.mxu0 %v324_v7  ;;  %v372_v7 = vld [vmem:[%s2853_s28 + $0x3c8] sm:$0xff] }
  0xda   : > { %1345 = vmatmul.mubr.f32.gmra.mrb[62].mxu1 %v416_v9  ;;  %v464_v9 = vld [vmem:[%s2853_s28 + $0x6a8] sm:$0xff] }
  0xdb   : > { %1349 = vmatprep.mubr.f32.mxu1 %v420_v10  ;;  %2598 = vmatpush3.bf16.msra.mxu1 %v3092_v23  ;;  %v428_v23 = vld [vmem:[%s2853_s28 + $0x588] sm:$0xff] }
  0xdc   : > { %820 = vmatmul.mubr.f32.gmra.mrb[48].mxu0 %v323_v38  ;;  %v468_v10 = vld [vmem:[%s2853_s28 + $0x6c8] sm:$0xff]  ;;  %v371_v38 = vld [vmem:[%s2853_s28 + $0x3c0] sm:$0xff] }
  0xdd   : > { %824 = vmatprep.mubr.f32.mxu0 %v327_v0  ;;  %v375_v0 = vld [vmem:[%s2853_s28 + $0x3e0] sm:$0xff] }
  0xde   : > { %1350 = vmatmul.mubr.f32.gmra.mrb[64].mxu1 %v419_v11  ;;  %v467_v11 = vld [vmem:[%s2853_s28 + $0x6c0] sm:$0xff] }
  0xdf   : > { %1354 = vmatprep.mubr.f32.mxu1 %v423_v50  ;;  %v471_v50 = vld [vmem:[%s2853_s28 + $0x6e0] sm:$0xff] }
  0xe0   : > { %825 = vmatmul.mubr.f32.gmra.mrb[50].mxu0 %v326_v12  ;;  %v374_v12 = vld [vmem:[%s2853_s28 + $0x3d8] sm:$0xff] }
  0xe1   : > { %829 = vmatprep.mubr.f32.mxu0 %v330_v13  ;;  %v378_v13 = vld [vmem:[%s2853_s28 + $0x3f8] sm:$0xff] }
  0xe2   : > { %1355 = vmatmul.mubr.f32.gmra.mrb[66].mxu1 %v422_v14  ;;  %v470_v14 = vld [vmem:[%s2853_s28 + $0x6d8] sm:$0xff] }
  0xe3   : > { %1359 = vmatprep.mubr.f32.mxu1 %v426_v15  ;;  %v474_v15 = vld [vmem:[%s2853_s28 + $0x6f8] sm:$0xff] }
  0xe4   : > { %830 = vmatmul.mubr.f32.gmra.mrb[52].mxu0 %v329_v16  ;;  %v377_v16 = vld [vmem:[%s2853_s28 + $0x3f0] sm:$0xff] }
  0xe5   : > { %834 = vmatprep.mubr.f32.mxu0 %v333_v17  ;;  %v381_v17 = vld [vmem:[%s2853_s28 + $0x410] sm:$0xff] }
  0xe6   : > { %1360 = vmatmul.mubr.f32.gmra.mrb[68].mxu1 %v425_v19  ;;  %v473_v19 = vld [vmem:[%s2853_s28 + $0x6f0] sm:$0xff] }
  0xe7   : > { %1364 = vmatprep.mubr.f32.mxu1 %v429_v20  ;;  %v477_v20 = vld [vmem:[%s2853_s28 + $0x710] sm:$0xff] }
  0xe8   : > { %835 = vmatmul.mubr.f32.gmra.mrb[54].mxu0 %v332_v21  ;;  %v380_v21 = vld [vmem:[%s2853_s28 + $0x408] sm:$0xff] }
  0xe9   : > { %839 = vmatprep.mubr.f32.mxu0 %v336_v22  ;;  %v384_v22 = vld [vmem:[%s2853_s28 + $0x428] sm:$0xff] }
  0xea   : > { %1365 = vmatmul.mubr.f32.gmra.mrb[70].mxu1 %v428_v23  ;;  %v476_v23 = vld [vmem:[%s2853_s28 + $0x708] sm:$0xff] }
  0xeb   : > { %1369 = vmatprep.mubr.f32.mxu1 %v432_v24  ;;  %v480_v24 = vld [vmem:[%s2853_s28 + $0x728] sm:$0xff] }
  0xec   : > { %840 = vmatmul.mubr.f32.gmra.mrb[56].mxu0 %v335_v25  ;;  %v383_v25 = vld [vmem:[%s2853_s28 + $0x420] sm:$0xff] }
  0xed   : > { %844 = vmatprep.mubr.f32.mxu0 %v339_v26  ;;  %v387_v26 = vld [vmem:[%s2853_s28 + $0x440] sm:$0xff] }
  0xee   : > { %1370 = vmatmul.mubr.f32.gmra.mrb[72].mxu1 %v431_v27  ;;  %v479_v27 = vld [vmem:[%s2853_s28 + $0x720] sm:$0xff] }
  0xef   : > { %1374 = vmatprep.mubr.f32.mxu1 %v435_v29  ;;  %v483_v29 = vld [vmem:[%s2853_s28 + $0x740] sm:$0xff] }
  0xf0   : > { %845 = vmatmul.mubr.f32.gmra.mrb[58].mxu0 %v338_v30  ;;  %v386_v30 = vld [vmem:[%s2853_s28 + $0x438] sm:$0xff] }
  0xf1   : > { %849 = vmatprep.mubr.f32.mxu0 %v342_v31  ;;  %v390_v31 = vld [vmem:[%s2853_s28 + $0x458] sm:$0xff] }
  0xf2   : > { %1375 = vmatmul.mubr.f32.gmra.mrb[74].mxu1 %v434_v32  ;;  %v482_v32 = vld [vmem:[%s2853_s28 + $0x738] sm:$0xff] }
  0xf3   : > { %1379 = vmatprep.mubr.f32.mxu1 %v438_v33  ;;  %v486_v33 = vld [vmem:[%s2853_s28 + $0x758] sm:$0xff] }
  0xf4   : > { %850 = vmatmul.mubr.f32.gmra.mrb[60].mxu0 %v341_v34 }
  0xf5   : > { %854 = vmatprep.mubr.f32.mxu0 %v345_v35  ;;  %v389_v35 = vld [vmem:[%s2853_s28 + $0x450] sm:$0xff] }
  0xf6   : > { %1380 = vmatmul.mubr.f32.gmra.mrb[76].mxu1 %v437_v36 }
  0xf7   : > { %1384 = vmatprep.mubr.f32.mxu1 %v441_v37  ;;  %v393_v37 = vld [vmem:[%s2853_s28 + $0x470] sm:$0xff] }
  0xf8   : > { %855 = vmatmul.mubr.f32.gmra.mrb[62].mxu0 %v344_v39  ;;  %v485_v39 = vld [vmem:[%s2853_s28 + $0x750] sm:$0xff] }
  0xf9   : > { %859 = vmatprep.mubr.f32.mxu0 %v348_v40  ;;  %v489_v40 = vld [vmem:[%s2853_s28 + $0x770] sm:$0xff] }
  0xfa   : > { %1385 = vmatmul.mubr.f32.gmra.mrb[78].mxu1 %v440_v41 }
  0xfb   : > { %1389 = vmatprep.mubr.f32.mxu1 %v444_v42  ;;  %v392_v42 = vld [vmem:[%s2853_s28 + $0x468] sm:$0xff] }
  0xfc   : > { %860 = vmatmul.mubr.f32.gmra.mrb[64].mxu0 %v347_v43 }
  0xfd   : > { %864 = vmatprep.mubr.f32.mxu0 %v351_v44  ;;  %v397_v44 = vld [vmem:[%s2853_s28 + $0x490] sm:$0xff] }
  0xfe   : > { %1390 = vmatmul.mubr.f32.gmra.mrb[80].mxu1 %v443_v45  ;;  %v488_v45 = vld [vmem:[%s2853_s28 + $0x768] sm:$0xff] }
  0xff   : > { %1394 = vmatprep.mubr.f32.mxu1 %v447_v46  ;;  %v492_v46 = vld [vmem:[%s2853_s28 + $0x788] sm:$0xff] }
 0x100   : > { %865 = vmatmul.mubr.f32.gmra.mrb[66].mxu0 %v350_v47 }
 0x101   : > { %869 = vmatprep.mubr.f32.mxu0 %v354_v48  ;;  %v400_v48 = vld [vmem:[%s2853_s28 + $0x4a8] sm:$0xff] }
 0x102   : > { %1395 = vmatmul.mubr.f32.gmra.mrb[82].mxu1 %v446_v49 }
 0x103   : > { %1399 = vmatprep.mubr.f32.mxu1 %v450_v52  ;;  %v403_v52 = vld [vmem:[%s2853_s28 + $0x4c0] sm:$0xff] }
 0x104   : > { %870 = vmatmul.mubr.f32.gmra.mrb[68].mxu0 %v353_v53  ;;  %v491_v53 = vld [vmem:[%s2853_s28 + $0x780] sm:$0xff] }
 0x105   : > { %874 = vmatprep.mubr.f32.mxu0 %v357_v54  ;;  %v495_v54 = vld [vmem:[%s2853_s28 + $0x7a0] sm:$0xff] }
 0x106   : > { %1400 = vmatmul.mubr.f32.gmra.mrb[84].mxu1 %v449_v55 }
 0x107   : > { %1404 = vmatprep.mubr.f32.mxu1 %v453_v51  ;;  %v406_v51 = vld [vmem:[%s2853_s28 + $0x4d8] sm:$0xff] }
 0x108   : > { %875 = vmatmul.mubr.f32.gmra.mrb[70].mxu0 %v356_v56 }
 0x109   : > { %879 = vmatprep.mubr.f32.mxu0 %v360_v57  ;;  %v409_v57 = vld [vmem:[%s2853_s28 + $0x4f0] sm:$0xff] }
 0x10a   : > { %1405 = vmatmul.mubr.f32.gmra.mrb[86].mxu1 %v452_v58  ;;  %v494_v58 = vld [vmem:[%s2853_s28 + $0x798] sm:$0xff] }
 0x10b   : > { %1409 = vmatprep.mubr.f32.mxu1 %v456_v59  ;;  %v498_v59 = vld [vmem:[%s2853_s28 + $0x7b8] sm:$0xff] }
 0x10c   : > { %880 = vmatmul.mubr.f32.gmra.mrb[72].mxu0 %v359_v61 }
 0x10d   : > { %884 = vmatprep.mubr.f32.mxu0 %v363_v60  ;;  %v412_v60 = vld [vmem:[%s2853_s28 + $0x508] sm:$0xff] }
 0x10e   : > { %1410 = vmatmul.mubr.f32.gmra.mrb[88].mxu1 %v455_v62 }
 0x10f   : > { %1414 = vmatprep.mubr.f32.mxu1 %v459_v63  ;;  %v415_v63 = vld [vmem:[%s2853_s28 + $0x520] sm:$0xff] }
 0x110   : > { %885 = vmatmul.mubr.f32.gmra.mrb[74].mxu0 %v362_v8  ;;  %v497_v8 = vld [vmem:[%s2853_s28 + $0x7b0] sm:$0xff] }
 0x111   : > { %889 = vmatprep.mubr.f32.mxu0 %v366_v1  ;;  %v501_v1 = vld [vmem:[%s2853_s28 + $0x7d0] sm:$0xff] }
 0x112   : > { %1415 = vmatmul.mubr.f32.gmra.mrb[90].mxu1 %v458_v2 }
 0x113   : > { %1419 = vmatprep.mubr.f32.mxu1 %v462_v3  ;;  %v418_v3 = vld [vmem:[%s2853_s28 + $0x538] sm:$0xff] }
 0x114   : > { %890 = vmatmul.mubr.f32.gmra.mrb[76].mxu0 %v365_v18 }
 0x115   : > { %894 = vmatprep.mubr.f32.mxu0 %v369_v4  ;;  %v421_v4 = vld [vmem:[%s2853_s28 + $0x550] sm:$0xff] }
 0x116   : > { %1420 = vmatmul.mubr.f32.gmra.mrb[92].mxu1 %v461_v5  ;;  %v500_v5 = vld [vmem:[%s2853_s28 + $0x7c8] sm:$0xff] }
 0x117   : > { %1424 = vmatprep.mubr.f32.mxu1 %v465_v6  ;;  %v504_v6 = vld [vmem:[%s2853_s28 + $0x7e8] sm:$0xff] }
 0x118   : > { %895 = vmatmul.mubr.f32.gmra.mrb[78].mxu0 %v368_v28 }
 0x119   : > { %899 = vmatprep.mubr.f32.mxu0 %v372_v7  ;;  %v424_v7 = vld [vmem:[%s2853_s28 + $0x568] sm:$0xff] }
 0x11a   : > { %1425 = vmatmul.mubr.f32.gmra.mrb[94].mxu1 %v464_v9 }
 0x11b   : > { %1429 = vmatprep.mubr.f32.mxu1 %v468_v10  ;;  %v427_v10 = vld [vmem:[%s2853_s28 + $0x580] sm:$0xff] }
 0x11c   : > { %900 = vmatmul.mubr.f32.gmra.mrb[80].mxu0 %v371_v38  ;;  %v503_v38 = vld [vmem:[%s2853_s28 + $0x7e0] sm:$0xff] }
 0x11d   : > { %904 = vmatprep.mubr.f32.mxu0 %v375_v0  ;;  %v507_v0 = vld [vmem:[%s2853_s28 + $0x800] sm:$0xff] }
 0x11e   : > { %1430 = vmatmul.mubr.f32.gmra.mrb[96].mxu1 %v467_v11 }
 0x11f   : > { %1434 = vmatprep.mubr.f32.mxu1 %v471_v50  ;;  %v430_v50 = vld [vmem:[%s2853_s28 + $0x598] sm:$0xff] }
 0x120   : > { %905 = vmatmul.mubr.f32.gmra.mrb[82].mxu0 %v374_v12 }
 0x121   : > { %909 = vmatprep.mubr.f32.mxu0 %v378_v13  ;;  %v433_v13 = vld [vmem:[%s2853_s28 + $0x5b0] sm:$0xff] }
 0x122   : > { %1435 = vmatmul.mubr.f32.gmra.mrb[98].mxu1 %v470_v14 }
 0x123   : > { %1439 = vmatprep.mubr.f32.mxu1 %v474_v15  ;;  %v506_v15 = vld [vmem:[%s2853_s28 + $0x7f8] sm:$0xff] }
 0x124   : > { %910 = vmatmul.mubr.f32.gmra.mrb[84].mxu0 %v377_v16 }
 0x125   : > { %914 = vmatprep.mubr.f32.mxu0 %v381_v17 }
 0x126   : > { %1440 = vmatmul.mubr.f32.gmra.mrb[100].mxu1 %v473_v19  ;;  %v510_v19 = vld [vmem:[%s2853_s28 + $0x818] sm:$0xff] }
 0x127   : > { %1444 = vmatprep.mubr.f32.mxu1 %v477_v20 }
 0x128   : > { %915 = vmatmul.mubr.f32.gmra.mrb[86].mxu0 %v380_v21  ;;  %v436_v21 = vld [vmem:[%s2853_s28 + $0x5c8] sm:$0xff] }
 0x129   : > { %919 = vmatprep.mubr.f32.mxu0 %v384_v22 }
 0x12a   : > { %1445 = vmatmul.mubr.f32.gmra.mrb[102].mxu1 %v476_v23  ;;  %v439_v23 = vld [vmem:[%s2853_s28 + $0x5e0] sm:$0xff] }
 0x12b   : > { %1449 = vmatprep.mubr.f32.mxu1 %v480_v24 }
 0x12c   : > { %920 = vmatmul.mubr.f32.gmra.mrb[88].mxu0 %v383_v25  ;;  %v509_v25 = vld [vmem:[%s2853_s28 + $0x810] sm:$0xff] }
 0x12d   : > { %924 = vmatprep.mubr.f32.mxu0 %v387_v26 }
 0x12e   : > { %1450 = vmatmul.mubr.f32.gmra.mrb[104].mxu1 %v479_v27 }
 0x12f   : > { %1454 = vmatprep.mubr.f32.mxu1 %v483_v29  ;;  %v513_v29 = vld [vmem:[%s2853_s28 + $0x830] sm:$0xff] }
 0x130   : > { %925 = vmatmul.mubr.f32.gmra.mrb[90].mxu0 %v386_v30 }
 0x131   : > { %v3248_v34 = vpop.f32.mrb[0].mxu1  ;;  %929 = vmatprep.mubr.f32.mxu0 %v390_v31  ;;  %v442_v31 = vld [vmem:[%s2853_s28 + $0x5f8] sm:$0xff] }
 0x132   : > { %v3251_v36 = vpop.f32.mrb[1].mxu1  ;;  %1455 = vmatmul.mubr.f32.gmra.mrb[106].mxu1 %v482_v32 }
 0x133   : > { %1459 = vmatprep.mubr.f32.mxu1 %v486_v33  ;;  %v445_v33 = vld [vmem:[%s2853_s28 + $0x610] sm:$0xff] }
 0x134   : > { %930 = vmatmul.mubr.f32.gmra.mrb[92].mxu0 %v389_v35 }
 0x135   : > { %v3256_v41 = vpop.f32.mrb[2].mxu1  ;;  %934 = vmatprep.mubr.f32.mxu0 %v393_v37 }
 0x136   : > { %v3259_v43 = vpop.f32.mrb[3].mxu1  ;;  %1460 = vmatmul.mubr.f32.gmra.mrb[108].mxu1 %v485_v39  ;;  %v516_v39 = vld [vmem:[%s2853_s28 + $0x848] sm:$0xff] }
 0x137   : > { %1464 = vmatprep.mubr.f32.mxu1 %v489_v40 }
 0x138   : > { %935 = vmatmul.mubr.f32.gmra.mrb[94].mxu0 %v392_v42  ;;  %v448_v42 = vld [vmem:[%s2853_s28 + $0x628] sm:$0xff] }
 0x139   : > { %v3264_v47 = vpop.f32.mrb[4].mxu1  ;;  %2351 = vmatprep.mubr.f32.mxu0 %v397_v44 }
 0x13a   : > { %v3267_v49 = vpop.f32.mrb[5].mxu1  ;;  %1465 = vmatmul.mubr.f32.gmra.mrb[110].mxu1 %v488_v45  ;;  %v451_v45 = vld [vmem:[%s2853_s28 + $0x640] sm:$0xff] }
 0x13b   : > { %1469 = vmatprep.mubr.f32.mxu1 %v492_v46 }
 0x13c   : > { %2352 = vmatmul.mubr.f32.vlgmr.msra.gmra.mrb[96].mxu0 %v400_v48 }
 0x13d   : > { %v3272_v55 = vpop.f32.mrb[6].mxu1  ;;  %2354 = vmatprep.mubr.f32.mxu0 %v403_v52 }
 0x13e   : > { %v3275_v56 = vpop.f32.mrb[7].mxu1  ;;  %1470 = vmatmul.mubr.f32.gmra.mrb[112].mxu1 %v491_v53  ;;  %v519_v53 = vld [vmem:[%s2853_s28 + $0x860] sm:$0xff] }
 0x13f   : > { %1474 = vmatprep.mubr.f32.mxu1 %v495_v54 }
 0x140   : > { %2355 = vmatmul.mubr.f32.gmra.mrb[98].mxu0 %v406_v51  ;;  %v454_v51 = vld [vmem:[%s2853_s28 + $0x658] sm:$0xff] }
 0x141   : > { %v3280_v61 = vpop.f32.mrb[8].mxu1  ;;  %2357 = vmatprep.mubr.f32.mxu0 %v409_v57 }
 0x142   : > { %v3283_v62 = vpop.f32.mrb[9].mxu1  ;;  %1475 = vmatmul.mubr.f32.gmra.mrb[114].mxu1 %v494_v58  ;;  %v457_v58 = vld [vmem:[%s2853_s28 + $0x670] sm:$0xff] }
 0x143   : > { %1479 = vmatprep.mubr.f32.mxu1 %v498_v59 }
 0x144   : > { %2358 = vmatmul.mubr.f32.gmra.mrb[100].mxu0 %v412_v60 }
 0x145   : > { %v3288_v2 = vpop.f32.mrb[10].mxu1  ;;  %2360 = vmatprep.mubr.f32.mxu0 %v415_v63 }
 0x146   : > { %v3291_v18 = vpop.f32.mrb[11].mxu1  ;;  %1480 = vmatmul.mubr.f32.gmra.mrb[116].mxu1 %v497_v8  ;;  %v522_v8 = vld [vmem:[%s2853_s28 + $0x878] sm:$0xff] }
 0x147   : > { %1484 = vmatprep.mubr.f32.mxu1 %v501_v1 }
 0x148   : > { %2361 = vmatmul.mubr.f32.gmra.mrb[102].mxu0 %v418_v3  ;;  %v460_v3 = vld [vmem:[%s2853_s28 + $0x688] sm:$0xff] }
 0x149   : > { %v3296_v28 = vpop.f32.mrb[12].mxu1  ;;  %2363 = vmatprep.mubr.f32.mxu0 %v421_v4 }
 0x14a   : > { %v3299_v9 = vpop.f32.mrb[13].mxu1  ;;  %1485 = vmatmul.mubr.f32.gmra.mrb[118].mxu1 %v500_v5  ;;  %v463_v5 = vld [vmem:[%s2853_s28 + $0x6a0] sm:$0xff] }
 0x14b   : > { %1489 = vmatprep.mubr.f32.mxu1 %v504_v6 }
 0x14c   : > { %2364 = vmatmul.mubr.f32.gmra.mrb[104].mxu0 %v424_v7 }
 0x14d   : > { %v3304_v11 = vpop.f32.mrb[14].mxu1  ;;  %2366 = vmatprep.mubr.f32.mxu0 %v427_v10 }
 0x14e   : > { %v3307_v12 = vpop.f32.mrb[15].mxu1  ;;  %1490 = vmatmul.mubr.f32.gmra.mrb[120].mxu1 %v503_v38  ;;  %v525_v38 = vld [vmem:[%s2853_s28 + $0x890] sm:$0xff] }
 0x14f   : > { %v701_v14 = vpop.f32.mrb[0].mxu0  ;;  %1494 = vmatprep.mubr.f32.mxu1 %v507_v0 }
 0x150   : > { %v1007_v16 = vadd.f32 %v3251_v36, %v701_v14  ;;  %2367 = vmatmul.mubr.f32.gmra.mrb[106].mxu0 %v430_v50  ;;  %v703_v17 = vpop.f32.mrb[1].mxu0  ;;  %v466_v50 = vld [vmem:[%s2853_s28 + $0x6b8] sm:$0xff]  ;;  %v469_v14 = vld [vmem:[%s2853_s28 + $0x6d0] sm:$0xff] }
 0x151   : > { %v3320_v20 = vpop.f32.mrb[16].mxu1  ;;  %2369 = vmatprep.mubr.f32.mxu0 %v433_v13 }
 0x152   : > { %1856 = vst.msk [vmem:[%s3315_s4] sm:$0xff] %vm1855_vm0, %v1007_v16  ;;  %v3325_v22 = vpop.f32.mrb[17].mxu1  ;;  %1495 = vmatmul.mubr.f32.gmra.mrb[122].mxu1 %v506_v15 }
 0x153   : > { %v706_v24 = vpop.f32.mrb[2].mxu0  ;;  %1499 = vmatprep.mubr.f32.mxu1 %v510_v19  ;;  %v528_v19 = vld [vmem:[%s2853_s28 + $0x8a8] sm:$0xff] }
 0x154   : > { %v1012_v26 = vadd.f32 %v3248_v34, %v706_v24  ;;  %2370 = vmatmul.mubr.f32.gmra.mrb[108].mxu0 %v436_v21  ;;  %v708_v27 = vpop.f32.mrb[3].mxu0  ;;  %v512_v34 = vld [vmem:[%s2853_s28 + $0x828] sm:$0xff] }
 0x155   : > { %v3331_v30 = vpop.f32.mrb[18].mxu1  ;;  %2372 = vmatprep.mubr.f32.mxu0 %v439_v23  ;;  %v472_v23 = vld [vmem:[%s2853_s28 + $0x6e8] sm:$0xff] }
 0x156   : > { %1857 = vst.msk [vmem:[%s3315_s4 + $0x8] sm:$0xff] %vm1855_vm0, %v1012_v26  ;;  %v3336_v32 = vpop.f32.mrb[19].mxu1  ;;  %1500 = vmatmul.mubr.f32.gmra.mrb[124].mxu1 %v509_v25  ;;  %v475_v25 = vld [vmem:[%s2853_s28 + $0x700] sm:$0xff] }
 0x157   : > { %v711_v35 = vpop.f32.mrb[4].mxu0  ;;  %1504 = vmatprep.mubr.f32.mxu1 %v513_v29 }
 0x158   : > { %v1017_v36 = vadd.f32 %v3259_v43, %v711_v35  ;;  %2373 = vmatmul.mubr.f32.gmra.mrb[110].mxu0 %v442_v31  ;;  %v713_v37 = vpop.f32.mrb[5].mxu0  ;;  %v515_v43 = vld [vmem:[%s2853_s28 + $0x840] sm:$0xff]  ;;  %v478_v35 = vld [vmem:[%s2853_s28 + $0x718] sm:$0xff] }
 0x159   : > { %v3342_v40 = vpop.f32.mrb[20].mxu1  ;;  %2375 = vmatprep.mubr.f32.mxu0 %v445_v33  ;;  %v531_v31 = vld [vmem:[%s2853_s28 + $0x8c0] sm:$0xff] }
 0x15a   : > { %1858 = vst.msk [vmem:[%s3315_s4 + $0x10] sm:$0xff] %vm1855_vm0, %v1017_v36  ;;  %v3347_v44 = vpop.f32.mrb[21].mxu1  ;;  %1505 = vmatmul.mubr.f32.gmra.mrb[126].mxu1 %v512_v34  ;;  %v481_v36 = vld [vmem:[%s2853_s28 + $0x730] sm:$0xff] }
 0x15b   : > { %v716_v46 = vpop.f32.mrb[6].mxu0  ;;  %1509 = vmatprep.mubr.f32.mxu1 %v516_v39 }
 0x15c   : > { %v1022_v48 = vadd.f32 %v3256_v41, %v716_v46  ;;  %2376 = vmatmul.mubr.f32.gmra.mrb[112].mxu0 %v448_v42  ;;  %v718_v52 = vpop.f32.mrb[7].mxu0  ;;  %v518_v41 = vld [vmem:[%s2853_s28 + $0x858] sm:$0xff] }
 0x15d   : > { %v3353_v54 = vpop.f32.mrb[22].mxu1  ;;  %2378 = vmatprep.mubr.f32.mxu0 %v451_v45  ;;  %v534_v45 = vld [vmem:[%s2853_s28 + $0x8d8] sm:$0xff]  ;;  %v487_v52 = vld [vmem:[%s2853_s28 + $0x760] sm:$0xff] }
 0x15e   : > { %1859 = vst.msk [vmem:[%s3315_s4 + $0x18] sm:$0xff] %vm1855_vm0, %v1022_v48  ;;  %v3358_v57 = vpop.f32.mrb[23].mxu1  ;;  %1510 = vmatmul.mubr.f32.gmra.mrb[128].mxu1 %v515_v43  ;;  %v484_v43 = vld [vmem:[%s2853_s28 + $0x748] sm:$0xff] }
 0x15f   : > { %v721_v59 = vpop.f32.mrb[8].mxu0  ;;  %1514 = vmatprep.mubr.f32.mxu1 %v519_v53 }
 0x160   : > { %v1027_v60 = vadd.f32 %v3267_v49, %v721_v59  ;;  %2379 = vmatmul.mubr.f32.gmra.mrb[114].mxu0 %v454_v51  ;;  %v723_v63 = vpop.f32.mrb[9].mxu0  ;;  %v521_v49 = vld [vmem:[%s2853_s28 + $0x870] sm:$0xff] }
 0x161   : > { %v3364_v1 = vpop.f32.mrb[24].mxu1  ;;  %2381 = vmatprep.mubr.f32.mxu0 %v457_v58  ;;  %v537_v59 = vld [vmem:[%s2853_s28 + $0x8f0] sm:$0xff] }
 0x162   : > { %1860 = vst.msk [vmem:[%s3315_s4 + $0x20] sm:$0xff] %vm1855_vm0, %v1027_v60  ;;  %v3369_v4 = vpop.f32.mrb[25].mxu1  ;;  %1515 = vmatmul.mubr.f32.gmra.mrb[130].mxu1 %v518_v41  ;;  %v490_v60 = vld [vmem:[%s2853_s28 + $0x778] sm:$0xff] }
 0x163   : > { %v726_v6 = vpop.f32.mrb[10].mxu0  ;;  %1519 = vmatprep.mubr.f32.mxu1 %v522_v8  ;;  %v493_v8 = vld [vmem:[%s2853_s28 + $0x790] sm:$0xff] }
 0x164   : > { %v1032_v7 = vadd.f32 %v3264_v47, %v726_v6  ;;  %2382 = vmatmul.mubr.f32.gmra.mrb[116].mxu0 %v460_v3  ;;  %v728_v10 = vpop.f32.mrb[11].mxu0  ;;  %v524_v47 = vld [vmem:[%s2853_s28 + $0x888] sm:$0xff] }
 0x165   : > { %v3375_v0 = vpop.f32.mrb[26].mxu1  ;;  %2384 = vmatprep.mubr.f32.mxu0 %v463_v5  ;;  %v496_v10 = vld [vmem:[%s2853_s28 + $0x7a8] sm:$0xff] }
 0x166   : > { %1861 = vst.msk [vmem:[%s3315_s4 + $0x28] sm:$0xff] %vm1855_vm0, %v1032_v7  ;;  %v3380_v13 = vpop.f32.mrb[27].mxu1  ;;  %1520 = vmatmul.mubr.f32.gmra.mrb[132].mxu1 %v521_v49  ;;  %v517_v49 = vld [vmem:[%s2853_s28 + $0x850] sm:$0xff] }
 0x167   : > { %v731_v15 = vpop.f32.mrb[12].mxu0  ;;  %1524 = vmatprep.mubr.f32.mxu1 %v525_v38 }
 0x168   : > { %v1037_v16 = vadd.f32 %v3275_v56, %v731_v15  ;;  %2385 = vmatmul.mubr.f32.gmra.mrb[118].mxu0 %v466_v50  ;;  %v733_v17 = vpop.f32.mrb[13].mxu0  ;;  %v527_v56 = vld [vmem:[%s2853_s28 + $0x8a0] sm:$0xff] }
 0x169   : > { %v3386_v21 = vpop.f32.mrb[28].mxu1  ;;  %2387 = vmatprep.mubr.f32.mxu0 %v469_v14  ;;  %v499_v50 = vld [vmem:[%s2853_s28 + $0x7c0] sm:$0xff] }
 0x16a   : > { %1862 = vst.msk [vmem:[%s3315_s4 + $0x30] sm:$0xff] %vm1855_vm0, %v1037_v16  ;;  %v3391_v24 = vpop.f32.mrb[29].mxu1  ;;  %1525 = vmatmul.mubr.f32.gmra.mrb[134].mxu1 %v524_v47  ;;  %v523_v16 = vld [vmem:[%s2853_s28 + $0x880] sm:$0xff] }
 0x16b   : > { %v736_v26 = vpop.f32.mrb[14].mxu0  ;;  %1529 = vmatprep.mubr.f32.mxu1 %v528_v19  ;;  %v502_v19 = vld [vmem:[%s2853_s28 + $0x7d8] sm:$0xff] }
 0x16c   : > { %v1042_v27 = vadd.f32 %v3272_v55, %v736_v26  ;;  %2388 = vmatmul.mubr.f32.gmra.mrb[120].mxu0 %v472_v23  ;;  %v738_v29 = vpop.f32.mrb[15].mxu0  ;;  %v530_v55 = vld [vmem:[%s2853_s28 + $0x8b8] sm:$0xff] }
 0x16d   : > { %v3397_v33 = vpop.f32.mrb[30].mxu1  ;;  %2390 = vmatprep.mubr.f32.mxu0 %v475_v25  ;;  %v505_v25 = vld [vmem:[%s2853_s28 + $0x7f0] sm:$0xff] }
 0x16e   : > { %1863 = vst.msk [vmem:[%s3315_s4 + $0x38] sm:$0xff] %vm1855_vm0, %v1042_v27  ;;  %v3402_v34 = vpop.f32.mrb[31].mxu1  ;;  %1530 = vmatmul.mubr.f32.gmra.mrb[136].mxu1 %v527_v56  ;;  %v529_v29 = vld [vmem:[%s2853_s28 + $0x8b0] sm:$0xff] }
 0x16f   : > { %v741_v37 = vpop.f32.mrb[16].mxu0  ;;  %1534 = vmatprep.mubr.f32.mxu1 %v531_v31 }
 0x170   : > { %v1047_v39 = vadd.f32 %v3283_v62, %v741_v37  ;;  %2391 = vmatmul.mubr.f32.gmra.mrb[122].mxu0 %v478_v35  ;;  %v743_v42 = vpop.f32.mrb[17].mxu0  ;;  %v533_v62 = vld [vmem:[%s2853_s28 + $0x8d0] sm:$0xff]  ;;  %v508_v35 = vld [vmem:[%s2853_s28 + $0x808] sm:$0xff]  ;;  %v511_v37 = vld [vmem:[%s2853_s28 + $0x820] sm:$0xff] }
 0x171   : > { %v3408_v46 = vpop.f32.mrb[32].mxu1  ;;  %2393 = vmatprep.mubr.f32.mxu0 %v481_v36 }
 0x172   : > { %1864 = vst.msk [vmem:[%s3315_s4 + $0x40] sm:$0xff] %vm1855_vm0, %v1047_v39  ;;  %v3413_v48 = vpop.f32.mrb[33].mxu1  ;;  %1535 = vmatmul.mubr.f32.gmra.mrb[138].mxu1 %v530_v55 }
 0x173   : > { %v746_v53 = vpop.f32.mrb[18].mxu0  ;;  %1539 = vmatprep.mubr.f32.mxu1 %v534_v45  ;;  %v535_v45 = vld [vmem:[%s2853_s28 + $0x8e0] sm:$0xff] }
 0x174   : > { %v1052_v51 = vadd.f32 %v3280_v61, %v746_v53  ;;  %2394 = vmatmul.mubr.f32.gmra.mrb[124].mxu0 %v484_v43  ;;  %v748_v58 = vpop.f32.mrb[19].mxu0  ;;  %v536_v61 = vld [vmem:[%s2853_s28 + $0x8e8] sm:$0xff] }
 0x175   : > { %v3419_v41 = vpop.f32.mrb[34].mxu1  ;;  %2396 = vmatprep.mubr.f32.mxu0 %v487_v52  ;;  %v514_v52 = vld [vmem:[%s2853_s28 + $0x838] sm:$0xff] }
 0x176   : > { %1865 = vst.msk [vmem:[%s3315_s4 + $0x48] sm:$0xff] %vm1855_vm0, %v1052_v51  ;;  %v3424_v63 = vpop.f32.mrb[35].mxu1  ;;  %1540 = vmatmul.mubr.f32.gmra.mrb[140].mxu1 %v533_v62  ;;  %v538_v51 = vld [vmem:[%s2853_s28 + $0x8f8] sm:$0xff] }
 0x177   : > { %v751_v3 = vpop.f32.mrb[20].mxu0  ;;  %1544 = vmatprep.mubr.f32.mxu1 %v537_v59 }
 0x178   : > { %v1057_v5 = vadd.f32 %v3291_v18, %v751_v3  ;;  %2397 = vmatmul.mubr.f32.gmra.mrb[126].mxu0 %v490_v60  ;;  %v753_v6 = vpop.f32.mrb[21].mxu0  ;;  %v520_v18 = vld [vmem:[%s2853_s28 + $0x868] sm:$0xff] }
 0x179   : > { %v3430_v7 = vpop.f32.mrb[36].mxu1  ;;  %2399 = vmatprep.mubr.f32.mxu0 %v493_v8 }
 0x17a   : > { %1866 = vst.msk [vmem:[%s3315_s4 + $0x50] sm:$0xff] %vm1855_vm0, %v1057_v5  ;;  %v3435_v38 = vpop.f32.mrb[37].mxu1  ;;  %1545 = vmatmul.mubr.f32.gmra.mrb[142].mxu1 %v536_v61 }
 0x17b   : > { %v756_v14 = vpop.f32.mrb[22].mxu0  ;;  %2411 = vmatprep.mubr.f32.mxu1 %v517_v49 }
 0x17c   : > { %v1062_v15 = vadd.f32 %v3288_v2, %v756_v14  ;;  %2400 = vmatmul.mubr.f32.gmra.mrb[128].mxu0 %v496_v10  ;;  %v758_v47 = vpop.f32.mrb[23].mxu0  ;;  %v526_v2 = vld [vmem:[%s2853_s28 + $0x898] sm:$0xff] }
 0x17d   : > { %v3441_v17 = vpop.f32.mrb[38].mxu1  ;;  %2402 = vmatprep.mubr.f32.mxu0 %v499_v50 }
 0x17e   : > { %1867 = vst.msk [vmem:[%s3315_s4 + $0x58] sm:$0xff] %vm1855_vm0, %v1062_v15  ;;  %v3446_v23 = vpop.f32.mrb[39].mxu1  ;;  %2412 = vmatmul.mubr.f32.vlgmr.msra.gmra.mrb[144].mxu1 %v520_v18 }
 0x17f   : > { %v761_v26 = vpop.f32.mrb[24].mxu0  ;;  %2414 = vmatprep.mubr.f32.mxu1 %v523_v16 }
 0x180   : > { %v1067_v56 = vadd.f32 %v3299_v9, %v761_v26  ;;  %2403 = vmatmul.mubr.f32.gmra.mrb[130].mxu0 %v502_v19  ;;  %v763_v27 = vpop.f32.mrb[25].mxu0  ;;  %v532_v9 = vld [vmem:[%s2853_s28 + $0x8c8] sm:$0xff] }
 0x181   : > { %v3452_v31 = vpop.f32.mrb[40].mxu1  ;;  %2405 = vmatprep.mubr.f32.mxu0 %v505_v25 }
 0x182   : > { %1868 = vst.msk [vmem:[%s3315_s4 + $0x60] sm:$0xff] %vm1855_vm0, %v1067_v56  ;;  %v3457_v36 = vpop.f32.mrb[41].mxu1  ;;  %2415 = vmatmul.mubr.f32.gmra.mrb[146].mxu1 %v526_v2 }
 0x183   : > { %v766_v55 = vpop.f32.mrb[26].mxu0  ;;  %2417 = vmatprep.mubr.f32.mxu1 %v529_v29 }
 0x184   : > { %v1072_v39 = vadd.f32 %v3296_v28, %v766_v55  ;;  %2406 = vmatmul.mubr.f32.gmra.mrb[132].mxu0 %v508_v35  ;;  %v768_v42 = vpop.f32.mrb[27].mxu0 }
 0x185   : > { %v3463_v43 = vpop.f32.mrb[42].mxu1  ;;  %2408 = vmatprep.mubr.f32.mxu0 %v511_v37 }
 0x186   : > { %1869 = vst.msk [vmem:[%s3315_s4 + $0x68] sm:$0xff] %vm1855_vm0, %v1072_v39  ;;  %v3468_v53 = vpop.f32.mrb[43].mxu1  ;;  %2418 = vmatmul.mubr.f32.gmra.mrb[148].mxu1 %v532_v9 }
 0x187   : > { %v771_v62 = vpop.f32.mrb[28].mxu0  ;;  %2420 = vmatprep.mubr.f32.mxu1 %v535_v45 }
 0x188   : > { %v1077_v58 = vadd.f32 %v3307_v12, %v771_v62  ;;  %2409 = vmatmul.mubr.f32.gmra.mrb[134].mxu0 %v514_v52  ;;  %v773_v28 = vpop.f32.mrb[29].mxu0 }
 0x189   : > { %v3472_v59 = vpop.f32.mrb[44].mxu1 }
 0x18a   : > { %1870 = vst.msk [vmem:[%s3315_s4 + $0x70] sm:$0xff] %vm1855_vm0, %v1077_v58  ;;  %v3476_v60 = vpop.f32.mrb[45].mxu1  ;;  %2421 = vmatmul.mubr.f32.gmra.mrb[150].mxu1 %v538_v51 }
 0x18b   : > { %v776_v8 = vpop.f32.mrb[30].mxu0 }
 0x18c   : > { %v1082_v3 = vadd.f32 %v3304_v11, %v776_v8  ;;  %v778_v61 = vpop.f32.mrb[31].mxu0 }
 0x18d   : > { %v3479_v5 = vpop.f32.mrb[46].mxu1 }
 0x18e   : > { %1871 = vst.msk [vmem:[%s3315_s4 + $0x78] sm:$0xff] %vm1855_vm0, %v1082_v3  ;;  %v3483_v12 = vpop.f32.mrb[47].mxu1 }
 0x18f   : > { %v781_v6 = vpop.f32.mrb[32].mxu0 }
 0x190   : > { %v1087_v49 = vadd.f32 %v3325_v22, %v781_v6  ;;  %v783_v10 = vpop.f32.mrb[33].mxu0 }
 0x191   : > { %v3486_v50 = vpop.f32.mrb[48].mxu1 }
 0x192   : > { %1872 = vst.msk [vmem:[%s3315_s4 + $0x80] sm:$0xff] %vm1855_vm0, %v1087_v49  ;;  %v1313_v14 = vpop.f32.mrb[49].mxu1 }
 0x193   : > { %v786_v18 = vpop.f32.mrb[34].mxu0 }
 0x194   : > { %v1092_v11 = vadd.f32 %v3320_v20, %v786_v18  ;;  %v788_v15 = vpop.f32.mrb[35].mxu0 }
 0x195   : > { %v3491_v47 = vpop.f32.mrb[50].mxu1 }
 0x196   : > { %1873 = vst.msk [vmem:[%s3315_s4 + $0x88] sm:$0xff] %vm1855_vm0, %v1092_v11  ;;  %v1318_v16 = vpop.f32.mrb[51].mxu1 }
 0x197   : > { %v791_v19 = vpop.f32.mrb[36].mxu0 }
 0x198   : > { %v1097_v22 = vadd.f32 %v3336_v32, %v791_v19  ;;  %v793_v25 = vpop.f32.mrb[37].mxu0 }
 0x199   : > { %v3496_v26 = vpop.f32.mrb[52].mxu1 }
 0x19a   : > { %1874 = vst.msk [vmem:[%s3315_s4 + $0x90] sm:$0xff] %vm1855_vm0, %v1097_v22  ;;  %v1323_v2 = vpop.f32.mrb[53].mxu1 }
 0x19b   : > { %v796_v56 = vpop.f32.mrb[38].mxu0 }
 0x19c   : > { %v1102_v20 = vadd.f32 %v3331_v30, %v796_v56  ;;  %v798_v27 = vpop.f32.mrb[39].mxu0 }
 0x19d   : > { %v3501_v29 = vpop.f32.mrb[54].mxu1 }
 0x19e   : > { %1875 = vst.msk [vmem:[%s3315_s4 + $0x98] sm:$0xff] %vm1855_vm0, %v1102_v20  ;;  %v1328_v35 = vpop.f32.mrb[55].mxu1 }
 0x19f   : > { %v801_v37 = vpop.f32.mrb[40].mxu0 }
 0x1a0   : > { %v1107_v32 = vadd.f32 %v3347_v44, %v801_v37  ;;  %v803_v55 = vpop.f32.mrb[41].mxu0 }
 0x1a1   : > { %v3506_v9 = vpop.f32.mrb[56].mxu1 }
 0x1a2   : > { %1876 = vst.msk [vmem:[%s3315_s4 + $0xa0] sm:$0xff] %vm1855_vm0, %v1107_v32  ;;  %v1333_v39 = vpop.f32.mrb[57].mxu1 }
 0x1a3   : > { %v806_v42 = vpop.f32.mrb[42].mxu0 }
 0x1a4   : > { %v1112_v30 = vadd.f32 %v3342_v40, %v806_v42  ;;  %v808_v45 = vpop.f32.mrb[43].mxu0 }
 0x1a5   : > { %v3511_v52 = vpop.f32.mrb[58].mxu1 }
 0x1a6   : > { %1877 = vst.msk [vmem:[%s3315_s4 + $0xa8] sm:$0xff] %vm1855_vm0, %v1112_v30  ;;  %v1338_v62 = vpop.f32.mrb[59].mxu1 }
 0x1a7   : > { %v811_v51 = vpop.f32.mrb[44].mxu0 }
 0x1a8   : > { %v1117_v44 = vadd.f32 %v3358_v57, %v811_v51  ;;  %v813_v58 = vpop.f32.mrb[45].mxu0 }
 0x1a9   : > { %v3516_v28 = vpop.f32.mrb[60].mxu1 }
 0x1aa   : > { %1878 = vst.msk [vmem:[%s3315_s4 + $0xb0] sm:$0xff] %vm1855_vm0, %v1117_v44  ;;  %v1343_v8 = vpop.f32.mrb[61].mxu1 }
 0x1ab   : > { %v816_v3 = vpop.f32.mrb[46].mxu0 }
 0x1ac   : > { %v1122_v40 = vadd.f32 %v3353_v54, %v816_v3  ;;  %v818_v61 = vpop.f32.mrb[47].mxu0 }
 0x1ad   : > { %v3521_v6 = vpop.f32.mrb[62].mxu1 }
 0x1ae   : > { %1879 = vst.msk [vmem:[%s3315_s4 + $0xb8] sm:$0xff] %vm1855_vm0, %v1122_v40  ;;  %v1348_v49 = vpop.f32.mrb[63].mxu1 }
 0x1af   : > { %v821_v10 = vpop.f32.mrb[48].mxu0 }
 0x1b0   : > { %v1127_v57 = vadd.f32 %v3369_v4, %v821_v10  ;;  %v823_v14 = vpop.f32.mrb[49].mxu0 }
 0x1b1   : > { %v3526_v18 = vpop.f32.mrb[64].mxu1 }
 0x1b2   : > { %1880 = vst.msk [vmem:[%s3315_s4 + $0xc0] sm:$0xff] %vm1855_vm0, %v1127_v57  ;;  %v1353_v11 = vpop.f32.mrb[65].mxu1 }
 0x1b3   : > { %v826_v15 = vpop.f32.mrb[50].mxu0 }
 0x1b4   : > { %v1132_v54 = vadd.f32 %v3364_v1, %v826_v15  ;;  %v828_v16 = vpop.f32.mrb[51].mxu0 }
 0x1b5   : > { %v3531_v19 = vpop.f32.mrb[66].mxu1 }
 0x1b6   : > { %1881 = vst.msk [vmem:[%s3315_s4 + $0xc8] sm:$0xff] %vm1855_vm0, %v1132_v54  ;;  %v1358_v22 = vpop.f32.mrb[67].mxu1 }
 0x1b7   : > { %v831_v25 = vpop.f32.mrb[52].mxu0 }
 0x1b8   : > { %v1137_v4 = vadd.f32 %v3380_v13, %v831_v25  ;;  %v833_v2 = vpop.f32.mrb[53].mxu0 }
 0x1b9   : > { %v3536_v56 = vpop.f32.mrb[68].mxu1 }
 0x1ba   : > { %1882 = vst.msk [vmem:[%s3315_s4 + $0xd0] sm:$0xff] %vm1855_vm0, %v1137_v4  ;;  %v1363_v20 = vpop.f32.mrb[69].mxu1 }
 0x1bb   : > { %v836_v27 = vpop.f32.mrb[54].mxu0 }
 0x1bc   : > { %v1142_v1 = vadd.f32 %v3375_v0, %v836_v27  ;;  %v838_v35 = vpop.f32.mrb[55].mxu0 }
 0x1bd   : > { %v3541_v37 = vpop.f32.mrb[70].mxu1 }
 0x1be   : > { %1883 = vst.msk [vmem:[%s3315_s4 + $0xd8] sm:$0xff] %vm1855_vm0, %v1142_v1  ;;  %v1368_v32 = vpop.f32.mrb[71].mxu1 }
 0x1bf   : > { %v841_v55 = vpop.f32.mrb[56].mxu0 }
 0x1c0   : > { %v1147_v13 = vadd.f32 %v3391_v24, %v841_v55  ;;  %v843_v39 = vpop.f32.mrb[57].mxu0 }
 0x1c1   : > { %v3546_v42 = vpop.f32.mrb[72].mxu1 }
 0x1c2   : > { %1884 = vst.msk [vmem:[%s3315_s4 + $0xe0] sm:$0xff] %vm1855_vm0, %v1147_v13  ;;  %v1373_v30 = vpop.f32.mrb[73].mxu1 }
 0x1c3   : > { %v846_v45 = vpop.f32.mrb[58].mxu0 }
 0x1c4   : > { %v1152_v0 = vadd.f32 %v3386_v21, %v846_v45  ;;  %v848_v62 = vpop.f32.mrb[59].mxu0 }
 0x1c5   : > { %v3551_v51 = vpop.f32.mrb[74].mxu1 }
 0x1c6   : > { %1885 = vst.msk [vmem:[%s3315_s4 + $0xe8] sm:$0xff] %vm1855_vm0, %v1152_v0  ;;  %v1378_v44 = vpop.f32.mrb[75].mxu1 }
 0x1c7   : > { %v851_v58 = vpop.f32.mrb[60].mxu0 }
 0x1c8   : > { %v1157_v24 = vadd.f32 %v3402_v34, %v851_v58  ;;  %v853_v8 = vpop.f32.mrb[61].mxu0 }
 0x1c9   : > { %v3556_v3 = vpop.f32.mrb[76].mxu1 }
 0x1ca   : > { %1886 = vst.msk [vmem:[%s3315_s4 + $0xf0] sm:$0xff] %vm1855_vm0, %v1157_v24  ;;  %v1383_v40 = vpop.f32.mrb[77].mxu1 }
 0x1cb   : > { %v856_v61 = vpop.f32.mrb[62].mxu0 }
 0x1cc   : > { %v1162_v21 = vadd.f32 %v3397_v33, %v856_v61  ;;  %v858_v49 = vpop.f32.mrb[63].mxu0 }
 0x1cd   : > { %v3561_v10 = vpop.f32.mrb[78].mxu1 }
 0x1ce   : > { %1887 = vst.msk [vmem:[%s3315_s4 + $0xf8] sm:$0xff] %vm1855_vm0, %v1162_v21  ;;  %v1388_v57 = vpop.f32.mrb[79].mxu1 }
 0x1cf   : > { %v861_v14 = vpop.f32.mrb[64].mxu0 }
 0x1d0   : > { %v1167_v34 = vadd.f32 %v3413_v48, %v861_v14  ;;  %v863_v11 = vpop.f32.mrb[65].mxu0 }
 0x1d1   : > { %v3566_v15 = vpop.f32.mrb[80].mxu1 }
 0x1d2   : > { %1888 = vst.msk [vmem:[%s3315_s4 + $0x100] sm:$0xff] %vm1855_vm0, %v1167_v34  ;;  %v1393_v54 = vpop.f32.mrb[81].mxu1 }
 0x1d3   : > { %v866_v16 = vpop.f32.mrb[66].mxu0 }
 0x1d4   : > { %v1172_v33 = vadd.f32 %v3408_v46, %v866_v16  ;;  %v868_v22 = vpop.f32.mrb[67].mxu0 }
 0x1d5   : > { %v3571_v25 = vpop.f32.mrb[82].mxu1 }
 0x1d6   : > { %1889 = vst.msk [vmem:[%s3315_s4 + $0x108] sm:$0xff] %vm1855_vm0, %v1172_v33  ;;  %v1398_v4 = vpop.f32.mrb[83].mxu1 }
 0x1d7   : > { %v871_v2 = vpop.f32.mrb[68].mxu0 }
 0x1d8   : > { %v1177_v48 = vadd.f32 %v3424_v63, %v871_v2  ;;  %v873_v20 = vpop.f32.mrb[69].mxu0 }
 0x1d9   : > { %v3576_v27 = vpop.f32.mrb[84].mxu1 }
 0x1da   : > { %1890 = vst.msk [vmem:[%s3315_s4 + $0x110] sm:$0xff] %vm1855_vm0, %v1177_v48  ;;  %v1403_v1 = vpop.f32.mrb[85].mxu1 }
 0x1db   : > { %v876_v35 = vpop.f32.mrb[70].mxu0 }
 0x1dc   : > { %v1182_v46 = vadd.f32 %v3419_v41, %v876_v35  ;;  %v878_v32 = vpop.f32.mrb[71].mxu0 }
 0x1dd   : > { %v3581_v55 = vpop.f32.mrb[86].mxu1 }
 0x1de   : > { %1891 = vst.msk [vmem:[%s3315_s4 + $0x118] sm:$0xff] %vm1855_vm0, %v1182_v46  ;;  %v1408_v13 = vpop.f32.mrb[87].mxu1 }
 0x1df   : > { %v881_v39 = vpop.f32.mrb[72].mxu0 }
 0x1e0   : > { %v1187_v63 = vadd.f32 %v3435_v38, %v881_v39  ;;  %v883_v30 = vpop.f32.mrb[73].mxu0 }
 0x1e1   : > { %v3586_v45 = vpop.f32.mrb[88].mxu1 }
 0x1e2   : > { %1892 = vst.msk [vmem:[%s3315_s4 + $0x120] sm:$0xff] %vm1855_vm0, %v1187_v63  ;;  %v1413_v0 = vpop.f32.mrb[89].mxu1 }
 0x1e3   : > { %v886_v62 = vpop.f32.mrb[74].mxu0 }
 0x1e4   : > { %v1192_v41 = vadd.f32 %v3430_v7, %v886_v62  ;;  %v888_v44 = vpop.f32.mrb[75].mxu0 }
 0x1e5   : > { %v3591_v58 = vpop.f32.mrb[90].mxu1 }
 0x1e6   : > { %1893 = vst.msk [vmem:[%s3315_s4 + $0x128] sm:$0xff] %vm1855_vm0, %v1192_v41  ;;  %v1418_v24 = vpop.f32.mrb[91].mxu1 }
 0x1e7   : > { %v891_v8 = vpop.f32.mrb[76].mxu0 }
 0x1e8   : > { %v1197_v38 = vadd.f32 %v3446_v23, %v891_v8  ;;  %v893_v40 = vpop.f32.mrb[77].mxu0 }
 0x1e9   : > { %v3596_v61 = vpop.f32.mrb[92].mxu1 }
 0x1ea   : > { %1894 = vst.msk [vmem:[%s3315_s4 + $0x130] sm:$0xff] %vm1855_vm0, %v1197_v38  ;;  %v1423_v21 = vpop.f32.mrb[93].mxu1 }
 0x1eb   : > { %v896_v49 = vpop.f32.mrb[78].mxu0 }
 0x1ec   : > { %v1202_v7 = vadd.f32 %v3441_v17, %v896_v49  ;;  %v898_v57 = vpop.f32.mrb[79].mxu0 }
 0x1ed   : > { %v3601_v14 = vpop.f32.mrb[94].mxu1 }
 0x1ee   : > { %1895 = vst.msk [vmem:[%s3315_s4 + $0x138] sm:$0xff] %vm1855_vm0, %v1202_v7  ;;  %v1428_v34 = vpop.f32.mrb[95].mxu1 }
 0x1ef   : > { %v901_v11 = vpop.f32.mrb[80].mxu0 }
 0x1f0   : > { %v1207_v23 = vadd.f32 %v3457_v36, %v901_v11  ;;  %v903_v54 = vpop.f32.mrb[81].mxu0 }
 0x1f1   : > { %v3606_v16 = vpop.f32.mrb[96].mxu1 }
 0x1f2   : > { %1896 = vst.msk [vmem:[%s3315_s4 + $0x140] sm:$0xff] %vm1855_vm0, %v1207_v23  ;;  %v1433_v33 = vpop.f32.mrb[97].mxu1 }
 0x1f3   : > { %v906_v22 = vpop.f32.mrb[82].mxu0 }
 0x1f4   : > { %v1212_v17 = vadd.f32 %v3452_v31, %v906_v22  ;;  %v908_v4 = vpop.f32.mrb[83].mxu0 }
 0x1f5   : > { %v3611_v2 = vpop.f32.mrb[98].mxu1 }
 0x1f6   : > { %1897 = vst.msk [vmem:[%s3315_s4 + $0x148] sm:$0xff] %vm1855_vm0, %v1212_v17  ;;  %v1438_v48 = vpop.f32.mrb[99].mxu1 }
 0x1f7   : > { %v911_v20 = vpop.f32.mrb[84].mxu0 }
 0x1f8   : > { %v1217_v36 = vadd.f32 %v3468_v53, %v911_v20  ;;  %v913_v1 = vpop.f32.mrb[85].mxu0 }
 0x1f9   : > { %v3616_v35 = vpop.f32.mrb[100].mxu1 }
 0x1fa   : > { %1898 = vst.msk [vmem:[%s3315_s4 + $0x150] sm:$0xff] %vm1855_vm0, %v1217_v36  ;;  %v1443_v46 = vpop.f32.mrb[101].mxu1 }
 0x1fb   : > { %v916_v32 = vpop.f32.mrb[86].mxu0 }
 0x1fc   : > { %v1222_v31 = vadd.f32 %v3463_v43, %v916_v32  ;;  %v918_v13 = vpop.f32.mrb[87].mxu0 }
 0x1fd   : > { %v3621_v39 = vpop.f32.mrb[102].mxu1 }
 0x1fe   : > { %1899 = vst.msk [vmem:[%s3315_s4 + $0x158] sm:$0xff] %vm1855_vm0, %v1222_v31  ;;  %v1448_v63 = vpop.f32.mrb[103].mxu1 }
 0x1ff   : > { %v921_v30 = vpop.f32.mrb[88].mxu0 }
 0x200   : > { %v1227_v53 = vadd.f32 %v3476_v60, %v921_v30  ;;  %v923_v0 = vpop.f32.mrb[89].mxu0 }
 0x201   : > { %v3626_v62 = vpop.f32.mrb[104].mxu1 }
 0x202   : > { %1900 = vst.msk [vmem:[%s3315_s4 + $0x160] sm:$0xff] %vm1855_vm0, %v1227_v53  ;;  %v1453_v41 = vpop.f32.mrb[105].mxu1 }
 0x203   : > { %v926_v44 = vpop.f32.mrb[90].mxu0 }
 0x204   : > { %v1232_v43 = vadd.f32 %v3472_v59, %v926_v44  ;;  %v928_v24 = vpop.f32.mrb[91].mxu0 }
 0x205   : > { %v3631_v8 = vpop.f32.mrb[106].mxu1 }
 0x206   : > { %1901 = vst.msk [vmem:[%s3315_s4 + $0x168] sm:$0xff] %vm1855_vm0, %v1232_v43  ;;  %v1458_v38 = vpop.f32.mrb[107].mxu1 }
 0x207   : > { %v931_v40 = vpop.f32.mrb[92].mxu0 }
 0x208   : > { %v1237_v21 = vadd.f32 %v3483_v12, %v931_v40  ;;  %v933_v60 = vpop.f32.mrb[93].mxu0 }
 0x209   : > { %v3636_v49 = vpop.f32.mrb[108].mxu1 }
 0x20a   : > { %1902 = vst.msk [vmem:[%s3315_s4 + $0x170] sm:$0xff] %vm1855_vm0, %v1237_v21  ;;  %v1463_v7 = vpop.f32.mrb[109].mxu1 }
 0x20b   : > { %v936_v57 = vpop.f32.mrb[94].mxu0 }
 0x20c   : > { %v1242_v59 = vadd.f32 %v3479_v5, %v936_v57  ;;  %v938_v34 = vpop.f32.mrb[95].mxu0 }
 0x20d   : > { %v3641_v11 = vpop.f32.mrb[110].mxu1 }
 0x20e   : > { %1903 = vst.msk [vmem:[%s3315_s4 + $0x178] sm:$0xff] %vm1855_vm0, %v1242_v59  ;;  %v1468_v23 = vpop.f32.mrb[111].mxu1 }
 0x20f   : > { %v2353_v12 = vpop.f32.mrb[96].mxu0 }
 0x210   : > { %v1622_v54 = vadd.f32 %v2353_v12, %v3491_v47  ;;  %v1616_v33 = vpop.f32.mrb[97].mxu0 }
 0x211   : > { %v3646_v22 = vpop.f32.mrb[112].mxu1  ;;  %v1617_v17 = vadd.f32 %v1616_v33, %v3486_v50 }
 0x212   : > { %1905 = vst.msk [vmem:[%s3315_s4 + $0x188] sm:$0xff] %vm1855_vm0, %v1622_v54  ;;  %v1473_v5 = vpop.f32.mrb[113].mxu1 }
 0x213   : > { %1904 = vst.msk [vmem:[%s3315_s4 + $0x180] sm:$0xff] %vm1855_vm0, %v1617_v17  ;;  %v2356_v4 = vpop.f32.mrb[98].mxu0 }
 0x214   : > { %v1632_v48 = vadd.f32 %v2356_v4, %v3501_v29  ;;  %v1626_v20 = vpop.f32.mrb[99].mxu0 }
 0x215   : > { %v3654_v36 = vpop.f32.mrb[114].mxu1  ;;  %v1627_v47 = vadd.f32 %v1626_v20, %v3496_v26 }
 0x216   : > { %1907 = vst.msk [vmem:[%s3315_s4 + $0x198] sm:$0xff] %vm1855_vm0, %v1632_v48  ;;  %v1478_v1 = vpop.f32.mrb[115].mxu1 }
 0x217   : > { %1906 = vst.msk [vmem:[%s3315_s4 + $0x190] sm:$0xff] %vm1855_vm0, %v1627_v47  ;;  %v2359_v50 = vpop.f32.mrb[100].mxu0 }
 0x218   : > { %v1642_v46 = vadd.f32 %v2359_v50, %v3511_v52  ;;  %v1636_v32 = vpop.f32.mrb[101].mxu0 }
 0x219   : > { %v3662_v31 = vpop.f32.mrb[116].mxu1  ;;  %v1637_v29 = vadd.f32 %v1636_v32, %v3506_v9 }
 0x21a   : > { %1909 = vst.msk [vmem:[%s3315_s4 + $0x1a8] sm:$0xff] %vm1855_vm0, %v1642_v46  ;;  %v1483_v13 = vpop.f32.mrb[117].mxu1 }
 0x21b   : > { %1908 = vst.msk [vmem:[%s3315_s4 + $0x1a0] sm:$0xff] %vm1855_vm0, %v1637_v29  ;;  %v2362_v26 = vpop.f32.mrb[102].mxu0 }
 0x21c   : > { %v1652_v63 = vadd.f32 %v2362_v26, %v3521_v6  ;;  %v1646_v30 = vpop.f32.mrb[103].mxu0 }
 0x21d   : > { %v3670_v53 = vpop.f32.mrb[118].mxu1  ;;  %v1647_v52 = vadd.f32 %v1646_v30, %v3516_v28 }
 0x21e   : > { %1911 = vst.msk [vmem:[%s3315_s4 + $0x1b8] sm:$0xff] %vm1855_vm0, %v1652_v63  ;;  %v1488_v0 = vpop.f32.mrb[119].mxu1 }
 0x21f   : > { %1910 = vst.msk [vmem:[%s3315_s4 + $0x1b0] sm:$0xff] %vm1855_vm0, %v1647_v52  ;;  %v2365_v9 = vpop.f32.mrb[104].mxu0 }
 0x220   : > { %v1662_v41 = vadd.f32 %v2365_v9, %v3531_v19  ;;  %v1656_v44 = vpop.f32.mrb[105].mxu0 }
 0x221   : > { %v3678_v43 = vpop.f32.mrb[120].mxu1  ;;  %v1657_v6 = vadd.f32 %v1656_v44, %v3526_v18 }
 0x222   : > { %1913 = vst.msk [vmem:[%s3315_s4 + $0x1c8] sm:$0xff] %vm1855_vm0, %v1662_v41  ;;  %v1493_v24 = vpop.f32.mrb[121].mxu1 }
 0x223   : > { %1912 = vst.msk [vmem:[%s3315_s4 + $0x1c0] sm:$0xff] %vm1855_vm0, %v1657_v6  ;;  %v2368_v28 = vpop.f32.mrb[106].mxu0 }
 0x224   : > { %v1672_v38 = vadd.f32 %v2368_v28, %v3541_v37  ;;  %v1666_v40 = vpop.f32.mrb[107].mxu0 }
 0x225   : > { %v3686_v21 = vpop.f32.mrb[122].mxu1  ;;  %v1667_v19 = vadd.f32 %v1666_v40, %v3536_v56 }
 0x226   : > { %1915 = vst.msk [vmem:[%s3315_s4 + $0x1d8] sm:$0xff] %vm1855_vm0, %v1672_v38  ;;  %v1498_v60 = vpop.f32.mrb[123].mxu1 }
 0x227   : > { %1914 = vst.msk [vmem:[%s3315_s4 + $0x1d0] sm:$0xff] %vm1855_vm0, %v1667_v19  ;;  %v2371_v18 = vpop.f32.mrb[108].mxu0 }
 0x228   : > { %v1682_v7 = vadd.f32 %v2371_v18, %v3551_v51  ;;  %v1676_v57 = vpop.f32.mrb[109].mxu0 }
 0x229   : > { %v3694_v59 = vpop.f32.mrb[124].mxu1  ;;  %v1677_v37 = vadd.f32 %v1676_v57, %v3546_v42 }
 0x22a   : > { %1917 = vst.msk [vmem:[%s3315_s4 + $0x1e8] sm:$0xff] %vm1855_vm0, %v1682_v7  ;;  %v1503_v34 = vpop.f32.mrb[125].mxu1 }
 0x22b   : > { %1916 = vst.msk [vmem:[%s3315_s4 + $0x1e0] sm:$0xff] %vm1855_vm0, %v1677_v37  ;;  %v2374_v56 = vpop.f32.mrb[110].mxu0 }
 0x22c   : > { %v1692_v23 = vadd.f32 %v2374_v56, %v3561_v10  ;;  %v1686_v12 = vpop.f32.mrb[111].mxu0 }
 0x22d   : > { %v3702_v54 = vpop.f32.mrb[126].mxu1  ;;  %v1687_v51 = vadd.f32 %v1686_v12, %v3556_v3 }
 0x22e   : > { %1919 = vst.msk [vmem:[%s3315_s4 + $0x1f8] sm:$0xff] %vm1855_vm0, %v1692_v23  ;;  %v1508_v33 = vpop.f32.mrb[127].mxu1 }
 0x22f   : > { %1918 = vst.msk [vmem:[%s3315_s4 + $0x1f0] sm:$0xff] %vm1855_vm0, %v1687_v51  ;;  %v2377_v42 = vpop.f32.mrb[112].mxu0 }
 0x230   : > { %v1702_v17 = vadd.f32 %v2377_v42, %v3571_v25  ;;  %v1696_v5 = vpop.f32.mrb[113].mxu0 }
 0x231   : > { %v3710_v4 = vpop.f32.mrb[128].mxu1  ;;  %v1697_v10 = vadd.f32 %v1696_v5, %v3566_v15 }
 0x232   : > { %1921 = vst.msk [vmem:[%s3315_s4 + $0x208] sm:$0xff] %vm1855_vm0, %v1702_v17  ;;  %v1513_v48 = vpop.f32.mrb[129].mxu1 }
 0x233   : > { %1920 = vst.msk [vmem:[%s3315_s4 + $0x200] sm:$0xff] %vm1855_vm0, %v1697_v10  ;;  %v2380_v3 = vpop.f32.mrb[114].mxu0 }
 0x234   : > { %v1712_v20 = vadd.f32 %v2380_v3, %v3581_v55  ;;  %v1706_v47 = vpop.f32.mrb[115].mxu0 }
 0x235   : > { %v1516_v1 = vpop.f32.mrb[130].mxu1  ;;  %v1707_v50 = vadd.f32 %v1706_v47, %v3576_v27 }
 0x236   : > { %1923 = vst.msk [vmem:[%s3315_s4 + $0x218] sm:$0xff] %vm1855_vm0, %v1712_v20  ;;  %v1518_v25 = vpop.f32.mrb[131].mxu1 }
 0x237   : > { %1922 = vst.msk [vmem:[%s3315_s4 + $0x210] sm:$0xff] %vm1855_vm0, %v1707_v50  ;;  %v2383_v15 = vpop.f32.mrb[116].mxu0 }
 0x238   : > { %v1722_v46 = vadd.f32 %v2383_v15, %v3591_v58  ;;  %v1716_v32 = vpop.f32.mrb[117].mxu0 }
 0x239   : > { %v3724_v29 = vpop.f32.mrb[132].mxu1  ;;  %v1717_v13 = vadd.f32 %v1716_v32, %v3586_v45 }
 0x23a   : > { %1925 = vst.msk [vmem:[%s3315_s4 + $0x228] sm:$0xff] %vm1855_vm0, %v1722_v46  ;;  %v1523_v55 = vpop.f32.mrb[133].mxu1 }
 0x23b   : > { %1924 = vst.msk [vmem:[%s3315_s4 + $0x220] sm:$0xff] %vm1855_vm0, %v1717_v13  ;;  %v2386_v27 = vpop.f32.mrb[118].mxu0 }
 0x23c   : > { %v1732_v26 = vadd.f32 %v2386_v27, %v3601_v14  ;;  %v1726_v63 = vpop.f32.mrb[119].mxu0 }
 0x23d   : > { %v1526_v30 = vpop.f32.mrb[134].mxu1  ;;  %v1727_v52 = vadd.f32 %v1726_v63, %v3596_v61 }
 0x23e   : > { %1927 = vst.msk [vmem:[%s3315_s4 + $0x238] sm:$0xff] %vm1855_vm0, %v1732_v26  ;;  %v1528_v58 = vpop.f32.mrb[135].mxu1 }
 0x23f   : > { %1926 = vst.msk [vmem:[%s3315_s4 + $0x230] sm:$0xff] %vm1855_vm0, %v1727_v52  ;;  %v2389_v45 = vpop.f32.mrb[120].mxu0 }
 0x240   : > { %v1742_v0 = vadd.f32 %v2389_v45, %v3611_v2  ;;  %v1736_v9 = vpop.f32.mrb[121].mxu0 }
 0x241   : > { %v1531_v41 = vpop.f32.mrb[136].mxu1  ;;  %v1737_v44 = vadd.f32 %v1736_v9, %v3606_v16 }
 0x242   : > { %1929 = vst.msk [vmem:[%s3315_s4 + $0x248] sm:$0xff] %vm1855_vm0, %v1742_v0  ;;  %v1533_v14 = vpop.f32.mrb[137].mxu1 }
 0x243   : > { %1928 = vst.msk [vmem:[%s3315_s4 + $0x240] sm:$0xff] %vm1855_vm0, %v1737_v44  ;;  %v2392_v61 = vpop.f32.mrb[122].mxu0 }
 0x244   : > { %v1752_v6 = vadd.f32 %v2392_v61, %v3621_v39  ;;  %v1746_v24 = vpop.f32.mrb[123].mxu0 }
 0x245   : > { %v1536_v28 = vpop.f32.mrb[138].mxu1  ;;  %v1747_v38 = vadd.f32 %v1746_v24, %v3616_v35 }
 0x246   : > { %1931 = vst.msk [vmem:[%s3315_s4 + $0x258] sm:$0xff] %vm1855_vm0, %v1752_v6  ;;  %v1538_v2 = vpop.f32.mrb[139].mxu1 }
 0x247   : > { %1930 = vst.msk [vmem:[%s3315_s4 + $0x250] sm:$0xff] %vm1855_vm0, %v1747_v38  ;;  %v2395_v16 = vpop.f32.mrb[124].mxu0 }
 0x248   : > { %v1762_v40 = vadd.f32 %v2395_v16, %v3631_v8  ;;  %v1756_v19 = vpop.f32.mrb[125].mxu0 }
 0x249   : > { %v1541_v60 = vpop.f32.mrb[140].mxu1  ;;  %v1757_v18 = vadd.f32 %v1756_v19, %v3626_v62 }
 0x24a   : > { %1933 = vst.msk [vmem:[%s3315_s4 + $0x268] sm:$0xff] %vm1855_vm0, %v1762_v40  ;;  %v1543_v39 = vpop.f32.mrb[141].mxu1 }
 0x24b   : > { %1932 = vst.msk [vmem:[%s3315_s4 + $0x260] sm:$0xff] %vm1855_vm0, %v1757_v18  ;;  %v2398_v35 = vpop.f32.mrb[126].mxu0 }
 0x24c   : > { %v1772_v7 = vadd.f32 %v2398_v35, %v3641_v11  ;;  %v1766_v57 = vpop.f32.mrb[127].mxu0 }
 0x24d   : > { %v1546_v37 = vpop.f32.mrb[142].mxu1  ;;  %v1767_v34 = vadd.f32 %v1766_v57, %v3636_v49 }
 0x24e   : > { %1935 = vst.msk [vmem:[%s3315_s4 + $0x278] sm:$0xff] %vm1855_vm0, %v1772_v7  ;;  %v1548_v8 = vpop.f32.mrb[143].mxu1 }
 0x24f   : > { %1934 = vst.msk [vmem:[%s3315_s4 + $0x270] sm:$0xff] %vm1855_vm0, %v1767_v34  ;;  %v2401_v62 = vpop.f32.mrb[128].mxu0 }
 0x250   : > { %v1782_v56 = vadd.f32 %v2401_v62, %v3654_v36  ;;  %v1776_v23 = vpop.f32.mrb[129].mxu0 }
 0x251   : > { %v1777_v12 = vadd.f32 %v1776_v23, %v3646_v22  ;;  %v2413_v51 = vpop.f32.mrb[144].mxu1 }
 0x252   : > { %1937 = vst.msk [vmem:[%s3315_s4 + $0x288] sm:$0xff] %vm1855_vm0, %v1782_v56  ;;  %v1822_v11 = vadd.f32 %v2413_v51, %v1516_v1  ;;  %v1816_v33 = vpop.f32.mrb[145].mxu1 }
 0x253   : > { %1936 = vst.msk [vmem:[%s3315_s4 + $0x280] sm:$0xff] %vm1855_vm0, %v1777_v12  ;;  %v1817_v49 = vadd.f32 %v1816_v33, %v3710_v4  ;;  %v2404_v42 = vpop.f32.mrb[130].mxu0 }
 0x254   : > { %1945 = vst.msk [vmem:[%s3315_s4 + $0x2c8] sm:$0xff] %vm1855_vm0, %v1822_v11  ;;  %v1792_v36 = vadd.f32 %v2404_v42, %v3670_v53  ;;  %v1786_v17 = vpop.f32.mrb[131].mxu0 }
 0x255   : > { %1944 = vst.msk [vmem:[%s3315_s4 + $0x2c0] sm:$0xff] %vm1855_vm0, %v1817_v49  ;;  %v1787_v22 = vadd.f32 %v1786_v17, %v3662_v31  ;;  %v2416_v5 = vpop.f32.mrb[146].mxu1 }
 0x256   : > { %1939 = vst.msk [vmem:[%s3315_s4 + $0x298] sm:$0xff] %vm1855_vm0, %v1792_v36  ;;  %v1832_v10 = vadd.f32 %v2416_v5, %v1526_v30  ;;  %v1826_v48 = vpop.f32.mrb[147].mxu1 }
 0x257   : > { %1938 = vst.msk [vmem:[%s3315_s4 + $0x290] sm:$0xff] %vm1855_vm0, %v1787_v22  ;;  %v1827_v4 = vadd.f32 %v1826_v48, %v3724_v29  ;;  %v2407_v3 = vpop.f32.mrb[132].mxu0 }
 0x258   : > { %1947 = vst.msk [vmem:[%s3315_s4 + $0x2d8] sm:$0xff] %vm1855_vm0, %v1832_v10  ;;  %v1802_v53 = vadd.f32 %v2407_v3, %v3686_v21  ;;  %v1796_v20 = vpop.f32.mrb[133].mxu0 }
 0x259   : > { %1946 = vst.msk [vmem:[%s3315_s4 + $0x2d0] sm:$0xff] %vm1855_vm0, %v1827_v4  ;;  %v1797_v31 = vadd.f32 %v1796_v20, %v3678_v43  ;;  %v2419_v47 = vpop.f32.mrb[148].mxu1 }
 0x25a   : > { %1941 = vst.msk [vmem:[%s3315_s4 + $0x2a8] sm:$0xff] %vm1855_vm0, %v1802_v53  ;;  %v1842_v1 = vadd.f32 %v2419_v47, %v1536_v28  ;;  %v1836_v50 = vpop.f32.mrb[149].mxu1 }
 0x25b   : > { %1940 = vst.msk [vmem:[%s3315_s4 + $0x2a0] sm:$0xff] %vm1855_vm0, %v1797_v31  ;;  %v1837_v25 = vadd.f32 %v1836_v50, %v1531_v41  ;;  %v2410_v15 = vpop.f32.mrb[134].mxu0 }
 0x25c   : > { %1949 = vst.msk [vmem:[%s3315_s4 + $0x2e8] sm:$0xff] %vm1855_vm0, %v1842_v1  ;;  %v1812_v21 = vadd.f32 %v2410_v15, %v3702_v54  ;;  %v1806_v46 = vpop.f32.mrb[135].mxu0 }
 0x25d   : > { %1948 = vst.msk [vmem:[%s3315_s4 + $0x2e0] sm:$0xff] %vm1855_vm0, %v1837_v25  ;;  %v1807_v43 = vadd.f32 %v1806_v46, %v3694_v59  ;;  %v2422_v32 = vpop.f32.mrb[150].mxu1 }
 0x25e   : > { %1943 = vst.msk [vmem:[%s3315_s4 + $0x2b8] sm:$0xff] %vm1855_vm0, %v1812_v21  ;;  %v1852_v29 = vadd.f32 %v2422_v32, %v1546_v37  ;;  %v1846_v13 = vpop.f32.mrb[151].mxu1 }
 0x25f   : > { %1942 = vst.msk [vmem:[%s3315_s4 + $0x2b0] sm:$0xff] %vm1855_vm0, %v1807_v43  ;;  %v1847_v55 = vadd.f32 %v1846_v13, %v1541_v60 }
 0x260   : > { %1951 = vst.msk [vmem:[%s3315_s4 + $0x2f8] sm:$0xff] %vm1855_vm0, %v1852_v29 }
 0x261   : > { %1950 = vst.msk [vmem:[%s3315_s4 + $0x2f0] sm:$0xff] %vm1855_vm0, %v1847_v55 }
 0x262 PF: > { %s15_s14 = sadd.s32 1, %s2741_s14   ;;  %s3826_s9 = smov %s2725_s10 }
 0x263   : > { %p12_p7 = scmp.ge.s32.totalorder %s15_s14, 8   ;;  %s3827_s10 = smov %s2729_s11 }
 0x264   : > { %s3828_s11 = smov %s2807_s20  ;;  %s3829_s12 = smov %s2737_s13 }
 0x265   : > { %s3830_s13 = smov %s3832_s16  ;;  %14 = sbr.rel (!%p12_p7) target bundleno = 4 (0x4), region = 71 }
 0x26c   :  { %1985 = vsyncpa [#allocation3], 1 }
 0x26d   :  { %1987 = vsyncpa [#allocation3 + $0x1], 1 }

</bundles_post_ra>
